<compile_context>
chip_gen: v7x
topology: tpu7x:2x2x1
jax: 0.10.0
libtpu: 0.0.40
codegen_flags: <defaults>
</compile_context>

<pallas_src>
import jax
import jax.numpy as jnp
from jax import lax
from jax.experimental import pallas as pl
from jax.experimental.pallas import tpu as pltpu

_EPS = 1e-5


def _up_kernel(x2wb_ref, x1aug_ref, uaug_ref, b1_ref, b2_ref,
               g1_ref, be1_ref, g2_ref, be2_ref, s_ref, st_ref,
               o_ref, mid_ref):
    # x2wb_ref : (N, H+2, W*C1)   x2 packed into lanes [0:W*Chalf), zeros + the
    #                             folded ConvTranspose bias in lanes [W*Chalf:);
    #                             H zero-padded by 1 row on each side.
    # x1aug_ref: (N, H+2, W*C1)   row-duplicated, parity-augmented, H-padded x1.
    # uaug_ref : (W*C1, W*C1)     ConvTranspose2d(k=2,s=2) as a matmul.
    # b1_ref   : (3, W*C1,  W*Cout)  conv1 band matrices (one per dy).
    # b2_ref   : (3, W*Cout, W*Cout) conv2 band matrices.
    # g*/be*   : (1, Cout)        BatchNorm gamma / beta.
    # s_ref    : (W*Cout, Cout)   packed-lane -> channel summing matrix.
    # st_ref   : (Cout, W*Cout)   channel -> packed-lane broadcast matrix.
    # o_ref    : (N, H, W*Cout)   packed output.
    # mid_ref  : VMEM scratch (N, H+2, W*Cout) for the H-padded mid activation.
    N, Hp, Lc = x2wb_ref.shape
    H = Hp - 2
    Lo = o_ref.shape[2]
    Cout = s_ref.shape[1]
    Ka = x1aug_ref.shape[2]
    M = N * H
    inv_count = 1.0 / float(M * (Lo // Cout))     # 1 / (N*H*W)

    # ---- ConvTranspose2d(k=2, s=2) upsample of x1 as ONE MXU matmul ---------
    up = jnp.dot(x1aug_ref[...].reshape(N * Hp, Ka), uaug_ref[...],
                 preferred_element_type=jnp.float32)          # (N*Hp, Lc)
    # channel-concat [x2 | up(x1)] == lane blocks [0:Lh) | [Lh:Lc); the
    # transposed-conv bias is already sitting in the upper lanes of x2wb.
    cat = x2wb_ref[...] + up.reshape(N, Hp, Lc)               # (N, Hp, Lc)

    def bn_relu(acc, g_ref, be_ref):
        # BatchNorm2d with batch statistics (biased variance, two-pass) + ReLU.
        # Per-channel stats in the packed (row, W*C) layout via tiny matmuls
        # with S / S^T; affine fused into a single scale/shift pass.
        col = jnp.sum(acc, axis=0, keepdims=True)                       # (1, Lo)
        mean_c = jnp.dot(col, s_ref[...],
                         preferred_element_type=jnp.float32) * inv_count
        mean_p = jnp.dot(mean_c, st_ref[...],
                         preferred_element_type=jnp.float32)            # (1, Lo)
        d = acc - mean_p
        var_c = jnp.dot(jnp.sum(d * d, axis=0, keepdims=True), s_ref[...],
                        preferred_element_type=jnp.float32) * inv_count
        scale_c = g_ref[...] * lax.rsqrt(var_c + _EPS)
        shift_c = be_ref[...] - mean_c * scale_c
        scale_p = jnp.dot(scale_c, st_ref[...], preferred_element_type=jnp.float32)
        shift_p = jnp.dot(shift_c, st_ref[...], preferred_element_type=jnp.float32)
        return jnp.maximum(acc * scale_p + shift_p, 0.0)

    # ---- conv1: 3x3, pad=1, no bias -> 3 band matmuls with K = W*C1 ---------
    acc1 = jnp.zeros((M, Lo), jnp.float32)
    for dy in range(3):
        acc1 = acc1 + jnp.dot(cat[:, dy:dy + H, :].reshape(M, Lc), b1_ref[dy],
                              preferred_element_type=jnp.float32)
    y1 = bn_relu(acc1, g1_ref, be1_ref)

    # ---- H-padded mid activation: zero only the two border rows -------------
    mid_ref[:, 1:H + 1, :] = y1.reshape(N, H, Lo)
    mid_ref[:, 0:1, :] = jnp.zeros((N, 1, Lo), jnp.float32)
    mid_ref[:, H + 1:H + 2, :] = jnp.zeros((N, 1, Lo), jnp.float32)

    # ---- conv2: 3x3, pad=1, no bias -> 3 band matmuls with K = W*Cout -------
    acc2 = jnp.zeros((M, Lo), jnp.float32)
    for dy in range(3):
        acc2 = acc2 + jnp.dot(mid_ref[:, dy:dy + H, :].reshape(M, Lo), b2_ref[dy],
                              preferred_element_type=jnp.float32)
    o_ref[...] = bn_relu(acc2, g2_ref, be2_ref).reshape(N, H, Lo)


def up_forward(x1_nchw, x2_nchw, wup, bup, w1, g1, be1, w2, g2, be2):
    """Up.forward(x1, x2).  x1/x2: NCHW; wup: (C1, C1//2, 2, 2) ConvTranspose2d
    weight; w1/w2: OIHW conv weights (bias=False); g/be: BatchNorm gamma/beta.
    """
    N, C1, H1, W1 = x1_nchw.shape
    N2, Chalf, H, W = x2_nchw.shape
    assert N2 == N and Chalf * 2 == C1
    # TODO(synk): support odd diffY/diffX (x2 spatial != 2 * x1 spatial) F.pad.
    assert H == 2 * H1 and W == 2 * W1
    Cout = w1.shape[0]
    f32 = jnp.float32

    Lh = W * Chalf         # packed lane width of x2 / upsampled-x1 halves
    Lc = W * C1            # packed lane width of the concatenated conv1 input
    Lo = W * Cout          # packed lane width of conv outputs
    K1 = W1 * C1           # packed lane width of an x1 row (2*K1 == Lc)

    # ---- activations: NCHW -> packed (N, H, W*C) rows -----------------------
    x2p = jnp.transpose(x2_nchw, (0, 2, 3, 1)).astype(f32).reshape(N, H, Lh)
    # Widen x2 to Lc lanes and fold the ConvTranspose2d bias into the (so far
    # zero) upper lanes; then H-pad with zero rows (pad rows must stay bias-free).
    x2w = jnp.pad(x2p, ((0, 0), (0, 0), (0, Lc - Lh)))
    bias_lane = jnp.concatenate([jnp.zeros((Lh,), f32),
                                 jnp.tile(bup.astype(f32), W)])
    x2wb = jnp.pad(x2w + bias_lane[None, None, :], ((0, 0), (1, 1), (0, 0)))

    # Row-duplicated, parity-augmented x1: output row h = 2i+a of the upsample
    # reads x1 row i through weight block U_a; we place x1 row i in half `a` of
    # the augmented row so a single matmul with uaug handles both parities.
    x1p = jnp.transpose(x1_nchw, (0, 2, 3, 1)).astype(f32).reshape(N, H1, K1)
    aug = jnp.zeros((N, H1, 2, 2 * K1), f32)
    aug = aug.at[:, :, 0, :K1].set(x1p)
    aug = aug.at[:, :, 1, K1:].set(x1p)
    x1aug = jnp.pad(aug.reshape(N, H, 2 * K1), ((0, 0), (1, 1), (0, 0)))

    # ---- weights -> matmul-ready matrices (built once, outside the kernel) --
    w1_hwio = jnp.transpose(w1, (2, 3, 1, 0)).astype(f32)    # (3,3,C1,Cout)
    w2_hwio = jnp.transpose(w2, (2, 3, 1, 0)).astype(f32)    # (3,3,Cout,Cout)
    wup_f = wup.astype(f32)                                  # (C1,Chalf,2,2)

    def band(w_hwio):
        # (3,3,Cin,Cout) -> (3, W*Cin, W*Cout) block-Toeplitz band matrices.
        return jnp.stack([
            sum(jnp.kron(jnp.eye(W, W, 1 - dx, dtype=f32), w_hwio[dy, dx])
                for dx in range(3))
            for dy in range(3)], axis=0)

    b1 = jnp.concatenate([band(w1_hwio[:, :, :Chalf, :]),     # x2 channels
                          band(w1_hwio[:, :, Chalf:, :])],    # upsampled-x1 ch.
                         axis=1)                              # (3, Lc, Lo)
    b2 = band(w2_hwio)                                        # (3, Lo, Lo)

    # ConvTranspose2d(k=2, s=2) as a (2*K1, Lc) matrix; output lands in the
    # upper Lh lanes (the x1 half of the concatenated layout).
    ua = []
    for a in range(2):
        Ua = jnp.zeros((K1, Lh), f32)
        for b in range(2):
            P = jnp.zeros((W1, W), f32)
            P = P.at[jnp.arange(W1), 2 * jnp.arange(W1) + b].set(1.0)
            Ua = Ua + jnp.kron(P, wup_f[:, :, a, b])
        ua.append(Ua)
    uaug = jnp.concatenate([jnp.zeros((2 * K1, Lh), f32),
                            jnp.concatenate(ua, axis=0)], axis=1)  # (2*K1, Lc)

    # Packed-lane <-> per-channel reduction / broadcast matrices for BN.
    S = jnp.kron(jnp.ones((W, 1), f32), jnp.eye(Cout, dtype=f32))  # (Lo, Cout)
    St = jnp.transpose(S)                                          # (Cout, Lo)

    out_packed = pl.pallas_call(
        _up_kernel,
        out_shape=jax.ShapeDtypeStruct((N, H, Lo), f32),
        in_specs=[pl.BlockSpec(memory_space=pltpu.MemorySpace.VMEM)] * 11,
        out_specs=pl.BlockSpec(memory_space=pltpu.MemorySpace.VMEM),
        scratch_shapes=[pltpu.VMEM((N, H + 2, Lo), f32)],
    )(x2wb, x1aug, uaug, b1, b2,
      g1.reshape(1, Cout).astype(f32), be1.reshape(1, Cout).astype(f32),
      g2.reshape(1, Cout).astype(f32), be2.reshape(1, Cout).astype(f32),
      S, St)

    return jnp.transpose(out_packed.reshape(N, H, W, Cout), (0, 3, 1, 2))


def _reference_up(x1, x2, wup, bup, w1, g1, be1, w2, g2, be2):
    """Pure-JAX reference matching the PyTorch `Up` module (NCHW / OIHW)."""
    N, C1, H1, W1 = x1.shape
    Chalf = wup.shape[1]
    # ConvTranspose2d(kernel=2, stride=2): non-overlapping scatter.
    t = jnp.einsum('ncij,cdab->ndiajb', x1, wup,
                   precision=lax.Precision.HIGHEST)
    x1u = t.reshape(N, Chalf, 2 * H1, 2 * W1) + bup.reshape(1, Chalf, 1, 1)
    x = jnp.concatenate([x2, x1u], axis=1)

    def conv(x, w):
        return lax.conv_general_dilated(
            x, w, window_strides=(1, 1), padding=((1, 1), (1, 1)),
            dimension_numbers=('NCHW', 'OIHW', 'NCHW'),
            precision=lax.Precision.HIGHEST)

    def bn_relu(x, g, b):
        mean = x.mean(axis=(0, 2, 3), keepdims=True)
        var = ((x - mean) ** 2).mean(axis=(0, 2, 3), keepdims=True)
        y = (x - mean) / jnp.sqrt(var + _EPS)
        y = y * g.reshape(1, -1, 1, 1) + b.reshape(1, -1, 1, 1)
        return jnp.maximum(y, 0.0)

    return bn_relu(conv(bn_relu(conv(x, w1), g1, be1), w2), g2, be2)


if __name__ == "__main__":
    # Up(in_channels=8, out_channels=8): x1 (N,8,8,8), skip x2 (N,4,16,16).
    N, C1, H1, W1 = 2, 8, 8, 8
    Chalf, Cout = C1 // 2, 8
    H2, W2 = 2 * H1, 2 * W1

    key = jax.random.PRNGKey(0)
    ks = jax.random.split(key, 10)
    x1 = jax.random.normal(ks[0], (N, C1, H1, W1), jnp.float32)
    x2 = jax.random.normal(ks[1], (N, Chalf, H2, W2), jnp.float32)
    wup = jax.random.normal(ks[2], (C1, Chalf, 2, 2), jnp.float32) * 0.2
    bup = jax.random.normal(ks[3], (Chalf,), jnp.float32) * 0.1
    w1 = jax.random.normal(ks[4], (Cout, C1, 3, 3), jnp.float32) * 0.1
    w2 = jax.random.normal(ks[5], (Cout, Cout, 3, 3), jnp.float32) * 0.1
    g1 = 1.0 + 0.1 * jax.random.normal(ks[6], (Cout,), jnp.float32)
    be1 = 0.1 * jax.random.normal(ks[7], (Cout,), jnp.float32)
    g2 = 1.0 + 0.1 * jax.random.normal(ks[8], (Cout,), jnp.float32)
    be2 = 0.1 * jax.random.normal(ks[9], (Cout,), jnp.float32)

    out = jax.block_until_ready(
        up_forward(x1, x2, wup, bup, w1, g1, be1, w2, g2, be2))
    ref = jax.block_until_ready(
        _reference_up(x1, x2, wup, bup, w1, g1, be1, w2, g2, be2))

    assert out.shape == (N, Cout, H2, W2), out.shape
    err = float(jnp.max(jnp.abs(out - ref)))
    assert jnp.allclose(out, ref, rtol=1e-3, atol=1e-3), err
    print("KERNEL_OK")
</pallas_src>

<mosaic_0001>
module attributes {stable_mosaic.version = 11 : i64} {
  func.func @_up_kernel(%arg0: memref<2x18x128xf32, #tpu.memory_space<vmem>>, %arg1: memref<2x18x128xf32, #tpu.memory_space<vmem>>, %arg2: memref<128x128xf32, #tpu.memory_space<vmem>>, %arg3: memref<3x128x128xf32, #tpu.memory_space<vmem>>, %arg4: memref<3x128x128xf32, #tpu.memory_space<vmem>>, %arg5: memref<1x8xf32, #tpu.memory_space<vmem>>, %arg6: memref<1x8xf32, #tpu.memory_space<vmem>>, %arg7: memref<1x8xf32, #tpu.memory_space<vmem>>, %arg8: memref<1x8xf32, #tpu.memory_space<vmem>>, %arg9: memref<128x8xf32, #tpu.memory_space<vmem>>, %arg10: memref<8x128xf32, #tpu.memory_space<vmem>>, %arg11: memref<2x16x128xf32, #tpu.memory_space<vmem>>, %arg12: memref<2x18x128xf32, #tpu.memory_space<vmem>>) attributes {dimension_semantics = [], scalar_prefetch = 0 : i64, scratch_operands = 1 : i64, tpu.core_type = #tpu.core_type<tc>} {
    %c0 = arith.constant 0 : index
    %c0_0 = arith.constant 0 : index
    %c0_1 = arith.constant 0 : index
    %0 = vector.load %arg1[%c0, %c0_0, %c0_1] : memref<2x18x128xf32, #tpu.memory_space<vmem>>, vector<2x18x128xf32>
    %1 = vector.shape_cast %0 : vector<2x18x128xf32> to vector<36x128xf32>
    %c0_2 = arith.constant 0 : index
    %c0_3 = arith.constant 0 : index
    %2 = vector.load %arg2[%c0_2, %c0_3] : memref<128x128xf32, #tpu.memory_space<vmem>>, vector<128x128xf32>
    %cst = arith.constant dense<0.000000e+00> : vector<36x128xf32>
    %3 = tpu.matmul %1, %2, %cst {dimension_numbers = #tpu.dot_dimension_numbers<[1], [0], [0], [1], [0, 0, 1, 1], [], []>} : vector<36x128xf32>, vector<128x128xf32>, vector<36x128xf32> -> vector<36x128xf32>
    %c0_4 = arith.constant 0 : index
    %c0_5 = arith.constant 0 : index
    %c0_6 = arith.constant 0 : index
    %4 = vector.load %arg0[%c0_4, %c0_5, %c0_6] : memref<2x18x128xf32, #tpu.memory_space<vmem>>, vector<2x18x128xf32>
    %5 = vector.shape_cast %3 : vector<36x128xf32> to vector<2x18x128xf32>
    %6 = arith.addf %4, %5 : vector<2x18x128xf32>
    %cst_7 = arith.constant 0.000000e+00 : f32
    %7 = vector.broadcast %cst_7 : f32 to vector<32x128xf32>
    %8 = vector.extract_strided_slice %6 {offsets = [0, 0, 0], sizes = [2, 16, 128], strides = [1, 1, 1]} : vector<2x18x128xf32> to vector<2x16x128xf32>
    %9 = vector.shape_cast %8 : vector<2x16x128xf32> to vector<32x128xf32>
    %c0_8 = arith.constant 0 : index
    %c0_9 = arith.constant 0 : index
    %c0_10 = arith.constant 0 : index
    %10 = vector.load %arg3[%c0_8, %c0_9, %c0_10] : memref<3x128x128xf32, #tpu.memory_space<vmem>>, vector<1x128x128xf32>
    %11 = vector.shape_cast %10 : vector<1x128x128xf32> to vector<128x128xf32>
    %cst_11 = arith.constant dense<0.000000e+00> : vector<32x128xf32>
    %12 = tpu.matmul %9, %11, %cst_11 {dimension_numbers = #tpu.dot_dimension_numbers<[1], [0], [0], [1], [0, 0, 1, 1], [], []>} : vector<32x128xf32>, vector<128x128xf32>, vector<32x128xf32> -> vector<32x128xf32>
    %13 = arith.addf %7, %12 : vector<32x128xf32>
    %14 = vector.extract_strided_slice %6 {offsets = [0, 1, 0], sizes = [2, 16, 128], strides = [1, 1, 1]} : vector<2x18x128xf32> to vector<2x16x128xf32>
    %15 = vector.shape_cast %14 : vector<2x16x128xf32> to vector<32x128xf32>
    %c1 = arith.constant 1 : index
    %c0_12 = arith.constant 0 : index
    %c0_13 = arith.constant 0 : index
    %16 = vector.load %arg3[%c1, %c0_12, %c0_13] : memref<3x128x128xf32, #tpu.memory_space<vmem>>, vector<1x128x128xf32>
    %17 = vector.shape_cast %16 : vector<1x128x128xf32> to vector<128x128xf32>
    %cst_14 = arith.constant dense<0.000000e+00> : vector<32x128xf32>
    %18 = tpu.matmul %15, %17, %cst_14 {dimension_numbers = #tpu.dot_dimension_numbers<[1], [0], [0], [1], [0, 0, 1, 1], [], []>} : vector<32x128xf32>, vector<128x128xf32>, vector<32x128xf32> -> vector<32x128xf32>
    %19 = arith.addf %13, %18 : vector<32x128xf32>
    %20 = vector.extract_strided_slice %6 {offsets = [0, 2, 0], sizes = [2, 16, 128], strides = [1, 1, 1]} : vector<2x18x128xf32> to vector<2x16x128xf32>
    %21 = vector.shape_cast %20 : vector<2x16x128xf32> to vector<32x128xf32>
    %c2 = arith.constant 2 : index
    %c0_15 = arith.constant 0 : index
    %c0_16 = arith.constant 0 : index
    %22 = vector.load %arg3[%c2, %c0_15, %c0_16] : memref<3x128x128xf32, #tpu.memory_space<vmem>>, vector<1x128x128xf32>
    %23 = vector.shape_cast %22 : vector<1x128x128xf32> to vector<128x128xf32>
    %cst_17 = arith.constant dense<0.000000e+00> : vector<32x128xf32>
    %24 = tpu.matmul %21, %23, %cst_17 {dimension_numbers = #tpu.dot_dimension_numbers<[1], [0], [0], [1], [0, 0, 1, 1], [], []>} : vector<32x128xf32>, vector<128x128xf32>, vector<32x128xf32> -> vector<32x128xf32>
    %25 = arith.addf %19, %24 : vector<32x128xf32>
    %cst_18 = arith.constant dense<0.000000e+00> : vector<128xf32>
    %26 = vector.multi_reduction <add>, %25, %cst_18 [0] : vector<32x128xf32> to vector<128xf32>
    %27 = vector.shape_cast %26 : vector<128xf32> to vector<1x128xf32>
    %c0_19 = arith.constant 0 : index
    %c0_20 = arith.constant 0 : index
    %28 = vector.load %arg9[%c0_19, %c0_20] : memref<128x8xf32, #tpu.memory_space<vmem>>, vector<128x8xf32>
    %cst_21 = arith.constant dense<0.000000e+00> : vector<1x8xf32>
    %29 = tpu.matmul %27, %28, %cst_21 {dimension_numbers = #tpu.dot_dimension_numbers<[1], [0], [0], [1], [0, 0, 1, 1], [], []>} : vector<1x128xf32>, vector<128x8xf32>, vector<1x8xf32> -> vector<1x8xf32>
    %cst_22 = arith.constant 0.001953125 : f32
    %30 = vector.broadcast %cst_22 : f32 to vector<1x8xf32>
    %31 = arith.mulf %29, %30 : vector<1x8xf32>
    %c0_23 = arith.constant 0 : index
    %c0_24 = arith.constant 0 : index
    %32 = vector.load %arg10[%c0_23, %c0_24] : memref<8x128xf32, #tpu.memory_space<vmem>>, vector<8x128xf32>
    %cst_25 = arith.constant dense<0.000000e+00> : vector<1x128xf32>
    %33 = tpu.matmul %31, %32, %cst_25 {dimension_numbers = #tpu.dot_dimension_numbers<[1], [0], [0], [1], [0, 0, 1, 1], [], []>} : vector<1x8xf32>, vector<8x128xf32>, vector<1x128xf32> -> vector<1x128xf32>
    %34 = vector.broadcast %33 : vector<1x128xf32> to vector<32x128xf32>
    %35 = arith.subf %25, %34 : vector<32x128xf32>
    %36 = arith.mulf %35, %35 : vector<32x128xf32>
    %cst_26 = arith.constant dense<0.000000e+00> : vector<128xf32>
    %37 = vector.multi_reduction <add>, %36, %cst_26 [0] : vector<32x128xf32> to vector<128xf32>
    %38 = vector.shape_cast %37 : vector<128xf32> to vector<1x128xf32>
    %c0_27 = arith.constant 0 : index
    %c0_28 = arith.constant 0 : index
    %39 = vector.load %arg9[%c0_27, %c0_28] : memref<128x8xf32, #tpu.memory_space<vmem>>, vector<128x8xf32>
    %cst_29 = arith.constant dense<0.000000e+00> : vector<1x8xf32>
    %40 = tpu.matmul %38, %39, %cst_29 {dimension_numbers = #tpu.dot_dimension_numbers<[1], [0], [0], [1], [0, 0, 1, 1], [], []>} : vector<1x128xf32>, vector<128x8xf32>, vector<1x8xf32> -> vector<1x8xf32>
    %cst_30 = arith.constant 0.001953125 : f32
    %41 = vector.broadcast %cst_30 : f32 to vector<1x8xf32>
    %42 = arith.mulf %40, %41 : vector<1x8xf32>
    %c0_31 = arith.constant 0 : index
    %c0_32 = arith.constant 0 : index
    %43 = vector.load %arg5[%c0_31, %c0_32] : memref<1x8xf32, #tpu.memory_space<vmem>>, vector<1x8xf32>
    %cst_33 = arith.constant 9.99999974E-6 : f32
    %44 = vector.broadcast %cst_33 : f32 to vector<1x8xf32>
    %45 = arith.addf %42, %44 : vector<1x8xf32>
    %46 = math.rsqrt %45 : vector<1x8xf32>
    %47 = arith.mulf %43, %46 : vector<1x8xf32>
    %c0_34 = arith.constant 0 : index
    %c0_35 = arith.constant 0 : index
    %48 = vector.load %arg6[%c0_34, %c0_35] : memref<1x8xf32, #tpu.memory_space<vmem>>, vector<1x8xf32>
    %49 = arith.mulf %31, %47 : vector<1x8xf32>
    %50 = arith.subf %48, %49 : vector<1x8xf32>
    %c0_36 = arith.constant 0 : index
    %c0_37 = arith.constant 0 : index
    %51 = vector.load %arg10[%c0_36, %c0_37] : memref<8x128xf32, #tpu.memory_space<vmem>>, vector<8x128xf32>
    %cst_38 = arith.constant dense<0.000000e+00> : vector<1x128xf32>
    %52 = tpu.matmul %47, %51, %cst_38 {dimension_numbers = #tpu.dot_dimension_numbers<[1], [0], [0], [1], [0, 0, 1, 1], [], []>} : vector<1x8xf32>, vector<8x128xf32>, vector<1x128xf32> -> vector<1x128xf32>
    %c0_39 = arith.constant 0 : index
    %c0_40 = arith.constant 0 : index
    %53 = vector.load %arg10[%c0_39, %c0_40] : memref<8x128xf32, #tpu.memory_space<vmem>>, vector<8x128xf32>
    %cst_41 = arith.constant dense<0.000000e+00> : vector<1x128xf32>
    %54 = tpu.matmul %50, %53, %cst_41 {dimension_numbers = #tpu.dot_dimension_numbers<[1], [0], [0], [1], [0, 0, 1, 1], [], []>} : vector<1x8xf32>, vector<8x128xf32>, vector<1x128xf32> -> vector<1x128xf32>
    %55 = vector.broadcast %52 : vector<1x128xf32> to vector<32x128xf32>
    %56 = arith.mulf %25, %55 : vector<32x128xf32>
    %57 = vector.broadcast %54 : vector<1x128xf32> to vector<32x128xf32>
    %58 = arith.addf %56, %57 : vector<32x128xf32>
    %cst_42 = arith.constant 0.000000e+00 : f32
    %59 = vector.broadcast %cst_42 : f32 to vector<32x128xf32>
    %60 = arith.maximumf %58, %59 : vector<32x128xf32>
    %61 = vector.shape_cast %60 : vector<32x128xf32> to vector<2x16x128xf32>
    %c0_43 = arith.constant 0 : index
    %c1_44 = arith.constant 1 : index
    %c0_45 = arith.constant 0 : index
    %62 = vector.load %arg12[%c0_43, %c1_44, %c0_45] : memref<2x18x128xf32, #tpu.memory_space<vmem>>, vector<2x16x128xf32>
    tpu.vector_store %arg12[%c0_43, %c1_44, %c0_45], %61 {strides = array<i32>} : memref<2x18x128xf32, #tpu.memory_space<vmem>>, vector<2x16x128xf32>,
    %cst_46 = arith.constant 0.000000e+00 : f32
    %63 = vector.broadcast %cst_46 : f32 to vector<2x1x128xf32>
    %c0_47 = arith.constant 0 : index
    %c0_48 = arith.constant 0 : index
    %c0_49 = arith.constant 0 : index
    %64 = vector.load %arg12[%c0_47, %c0_48, %c0_49] : memref<2x18x128xf32, #tpu.memory_space<vmem>>, vector<2x1x128xf32>
    tpu.vector_store %arg12[%c0_47, %c0_48, %c0_49], %63 {strides = array<i32>} : memref<2x18x128xf32, #tpu.memory_space<vmem>>, vector<2x1x128xf32>,
    %cst_50 = arith.constant 0.000000e+00 : f32
    %65 = vector.broadcast %cst_50 : f32 to vector<2x1x128xf32>
    %c0_51 = arith.constant 0 : index
    %c17 = arith.constant 17 : index
    %c0_52 = arith.constant 0 : index
    %66 = vector.load %arg12[%c0_51, %c17, %c0_52] : memref<2x18x128xf32, #tpu.memory_space<vmem>>, vector<2x1x128xf32>
    tpu.vector_store %arg12[%c0_51, %c17, %c0_52], %65 {strides = array<i32>} : memref<2x18x128xf32, #tpu.memory_space<vmem>>, vector<2x1x128xf32>,
    %cst_53 = arith.constant 0.000000e+00 : f32
    %67 = vector.broadcast %cst_53 : f32 to vector<32x128xf32>
    %c0_54 = arith.constant 0 : index
    %c0_55 = arith.constant 0 : index
    %c0_56 = arith.constant 0 : index
    %68 = vector.load %arg12[%c0_54, %c0_55, %c0_56] : memref<2x18x128xf32, #tpu.memory_space<vmem>>, vector<2x16x128xf32>
    %69 = vector.shape_cast %68 : vector<2x16x128xf32> to vector<32x128xf32>
    %c0_57 = arith.constant 0 : index
    %c0_58 = arith.constant 0 : index
    %c0_59 = arith.constant 0 : index
    %70 = vector.load %arg4[%c0_57, %c0_58, %c0_59] : memref<3x128x128xf32, #tpu.memory_space<vmem>>, vector<1x128x128xf32>
    %71 = vector.shape_cast %70 : vector<1x128x128xf32> to vector<128x128xf32>
    %cst_60 = arith.constant dense<0.000000e+00> : vector<32x128xf32>
    %72 = tpu.matmul %69, %71, %cst_60 {dimension_numbers = #tpu.dot_dimension_numbers<[1], [0], [0], [1], [0, 0, 1, 1], [], []>} : vector<32x128xf32>, vector<128x128xf32>, vector<32x128xf32> -> vector<32x128xf32>
    %73 = arith.addf %67, %72 : vector<32x128xf32>
    %c0_61 = arith.constant 0 : index
    %c1_62 = arith.constant 1 : index
    %c0_63 = arith.constant 0 : index
    %74 = vector.load %arg12[%c0_61, %c1_62, %c0_63] : memref<2x18x128xf32, #tpu.memory_space<vmem>>, vector<2x16x128xf32>
    %75 = vector.shape_cast %74 : vector<2x16x128xf32> to vector<32x128xf32>
    %c1_64 = arith.constant 1 : index
    %c0_65 = arith.constant 0 : index
    %c0_66 = arith.constant 0 : index
    %76 = vector.load %arg4[%c1_64, %c0_65, %c0_66] : memref<3x128x128xf32, #tpu.memory_space<vmem>>, vector<1x128x128xf32>
    %77 = vector.shape_cast %76 : vector<1x128x128xf32> to vector<128x128xf32>
    %cst_67 = arith.constant dense<0.000000e+00> : vector<32x128xf32>
    %78 = tpu.matmul %75, %77, %cst_67 {dimension_numbers = #tpu.dot_dimension_numbers<[1], [0], [0], [1], [0, 0, 1, 1], [], []>} : vector<32x128xf32>, vector<128x128xf32>, vector<32x128xf32> -> vector<32x128xf32>
    %79 = arith.addf %73, %78 : vector<32x128xf32>
    %c0_68 = arith.constant 0 : index
    %c2_69 = arith.constant 2 : index
    %c0_70 = arith.constant 0 : index
    %80 = vector.load %arg12[%c0_68, %c2_69, %c0_70] : memref<2x18x128xf32, #tpu.memory_space<vmem>>, vector<2x16x128xf32>
    %81 = vector.shape_cast %80 : vector<2x16x128xf32> to vector<32x128xf32>
    %c2_71 = arith.constant 2 : index
    %c0_72 = arith.constant 0 : index
    %c0_73 = arith.constant 0 : index
    %82 = vector.load %arg4[%c2_71, %c0_72, %c0_73] : memref<3x128x128xf32, #tpu.memory_space<vmem>>, vector<1x128x128xf32>
    %83 = vector.shape_cast %82 : vector<1x128x128xf32> to vector<128x128xf32>
    %cst_74 = arith.constant dense<0.000000e+00> : vector<32x128xf32>
    %84 = tpu.matmul %81, %83, %cst_74 {dimension_numbers = #tpu.dot_dimension_numbers<[1], [0], [0], [1], [0, 0, 1, 1], [], []>} : vector<32x128xf32>, vector<128x128xf32>, vector<32x128xf32> -> vector<32x128xf32>
    %85 = arith.addf %79, %84 : vector<32x128xf32>
    %cst_75 = arith.constant dense<0.000000e+00> : vector<128xf32>
    %86 = vector.multi_reduction <add>, %85, %cst_75 [0] : vector<32x128xf32> to vector<128xf32>
    %87 = vector.shape_cast %86 : vector<128xf32> to vector<1x128xf32>
    %c0_76 = arith.constant 0 : index
    %c0_77 = arith.constant 0 : index
    %88 = vector.load %arg9[%c0_76, %c0_77] : memref<128x8xf32, #tpu.memory_space<vmem>>, vector<128x8xf32>
    %cst_78 = arith.constant dense<0.000000e+00> : vector<1x8xf32>
    %89 = tpu.matmul %87, %88, %cst_78 {dimension_numbers = #tpu.dot_dimension_numbers<[1], [0], [0], [1], [0, 0, 1, 1], [], []>} : vector<1x128xf32>, vector<128x8xf32>, vector<1x8xf32> -> vector<1x8xf32>
    %cst_79 = arith.constant 0.001953125 : f32
    %90 = vector.broadcast %cst_79 : f32 to vector<1x8xf32>
    %91 = arith.mulf %89, %90 : vector<1x8xf32>
    %c0_80 = arith.constant 0 : index
    %c0_81 = arith.constant 0 : index
    %92 = vector.load %arg10[%c0_80, %c0_81] : memref<8x128xf32, #tpu.memory_space<vmem>>, vector<8x128xf32>
    %cst_82 = arith.constant dense<0.000000e+00> : vector<1x128xf32>
    %93 = tpu.matmul %91, %92, %cst_82 {dimension_numbers = #tpu.dot_dimension_numbers<[1], [0], [0], [1], [0, 0, 1, 1], [], []>} : vector<1x8xf32>, vector<8x128xf32>, vector<1x128xf32> -> vector<1x128xf32>
    %94 = vector.broadcast %93 : vector<1x128xf32> to vector<32x128xf32>
    %95 = arith.subf %85, %94 : vector<32x128xf32>
    %96 = arith.mulf %95, %95 : vector<32x128xf32>
    %cst_83 = arith.constant dense<0.000000e+00> : vector<128xf32>
    %97 = vector.multi_reduction <add>, %96, %cst_83 [0] : vector<32x128xf32> to vector<128xf32>
    %98 = vector.shape_cast %97 : vector<128xf32> to vector<1x128xf32>
    %c0_84 = arith.constant 0 : index
    %c0_85 = arith.constant 0 : index
    %99 = vector.load %arg9[%c0_84, %c0_85] : memref<128x8xf32, #tpu.memory_space<vmem>>, vector<128x8xf32>
    %cst_86 = arith.constant dense<0.000000e+00> : vector<1x8xf32>
    %100 = tpu.matmul %98, %99, %cst_86 {dimension_numbers = #tpu.dot_dimension_numbers<[1], [0], [0], [1], [0, 0, 1, 1], [], []>} : vector<1x128xf32>, vector<128x8xf32>, vector<1x8xf32> -> vector<1x8xf32>
    %cst_87 = arith.constant 0.001953125 : f32
    %101 = vector.broadcast %cst_87 : f32 to vector<1x8xf32>
    %102 = arith.mulf %100, %101 : vector<1x8xf32>
    %c0_88 = arith.constant 0 : index
    %c0_89 = arith.constant 0 : index
    %103 = vector.load %arg7[%c0_88, %c0_89] : memref<1x8xf32, #tpu.memory_space<vmem>>, vector<1x8xf32>
    %cst_90 = arith.constant 9.99999974E-6 : f32
    %104 = vector.broadcast %cst_90 : f32 to vector<1x8xf32>
    %105 = arith.addf %102, %104 : vector<1x8xf32>
    %106 = math.rsqrt %105 : vector<1x8xf32>
    %107 = arith.mulf %103, %106 : vector<1x8xf32>
    %c0_91 = arith.constant 0 : index
    %c0_92 = arith.constant 0 : index
    %108 = vector.load %arg8[%c0_91, %c0_92] : memref<1x8xf32, #tpu.memory_space<vmem>>, vector<1x8xf32>
    %109 = arith.mulf %91, %107 : vector<1x8xf32>
    %110 = arith.subf %108, %109 : vector<1x8xf32>
    %c0_93 = arith.constant 0 : index
    %c0_94 = arith.constant 0 : index
    %111 = vector.load %arg10[%c0_93, %c0_94] : memref<8x128xf32, #tpu.memory_space<vmem>>, vector<8x128xf32>
    %cst_95 = arith.constant dense<0.000000e+00> : vector<1x128xf32>
    %112 = tpu.matmul %107, %111, %cst_95 {dimension_numbers = #tpu.dot_dimension_numbers<[1], [0], [0], [1], [0, 0, 1, 1], [], []>} : vector<1x8xf32>, vector<8x128xf32>, vector<1x128xf32> -> vector<1x128xf32>
    %c0_96 = arith.constant 0 : index
    %c0_97 = arith.constant 0 : index
    %113 = vector.load %arg10[%c0_96, %c0_97] : memref<8x128xf32, #tpu.memory_space<vmem>>, vector<8x128xf32>
    %cst_98 = arith.constant dense<0.000000e+00> : vector<1x128xf32>
    %114 = tpu.matmul %110, %113, %cst_98 {dimension_numbers = #tpu.dot_dimension_numbers<[1], [0], [0], [1], [0, 0, 1, 1], [], []>} : vector<1x8xf32>, vector<8x128xf32>, vector<1x128xf32> -> vector<1x128xf32>
    %115 = vector.broadcast %112 : vector<1x128xf32> to vector<32x128xf32>
    %116 = arith.mulf %85, %115 : vector<32x128xf32>
    %117 = vector.broadcast %114 : vector<1x128xf32> to vector<32x128xf32>
    %118 = arith.addf %116, %117 : vector<32x128xf32>
    %cst_99 = arith.constant 0.000000e+00 : f32
    %119 = vector.broadcast %cst_99 : f32 to vector<32x128xf32>
    %120 = arith.maximumf %118, %119 : vector<32x128xf32>
    %121 = vector.shape_cast %120 : vector<32x128xf32> to vector<2x16x128xf32>
    %c0_100 = arith.constant 0 : index
    %c0_101 = arith.constant 0 : index
    %c0_102 = arith.constant 0 : index
    %122 = vector.load %arg11[%c0_100, %c0_101, %c0_102] : memref<2x16x128xf32, #tpu.memory_space<vmem>>, vector<2x16x128xf32>
    tpu.vector_store %arg11[%c0_100, %c0_101, %c0_102], %121 {strides = array<i32>} : memref<2x16x128xf32, #tpu.memory_space<vmem>>, vector<2x16x128xf32>,
    return
  }
}

</mosaic_0001>

<bundles_post_ra>
// kernel: tpu_custom_call.1
= control target key start
LH: loop header
LB: loop body
LE: loop exit
PB: predicated region body
PF: predicated region fallthrough
CT: control target
= control target key end

     0   :  { %16 = vsyncpa [#allocation4], 0  ;;  %s3714_s0 = inlined_call_operand.vmem [shape: f32[2,18,128], index: 0, kind: input, shape index: {}]   ;;  %s3715_s1 = inlined_call_operand.vmem [shape: f32[2,18,128], index: 1, kind: input, shape index: {}]   ;;  %s3716_s2 = inlined_call_operand.vmem [shape: f32[128,128], index: 2, kind: input, shape index: {}]   ;;  %s3717_s3 = inlined_call_operand.hbm [shape: f32[3,128,128], index: 3, kind: input, shape index: {}]   ;;  %s3718_s4 = inlined_call_operand.hbm [shape: f32[3,128,128], index: 4, kind: input, shape index: {}]   ;;  %s3719_s5 = inlined_call_operand.vmem [shape: f32[1,8], index: 5, kind: input, shape index: {}]   ;;  %s3720_s6 = inlined_call_operand.vmem [shape: f32[1,8], index: 6, kind: input, shape index: {}]   ;;  %s3721_s7 = inlined_call_operand.vmem [shape: f32[1,8], index: 7, kind: input, shape index: {}]   ;;  %s3722_s8 = inlined_call_operand.vmem [shape: f32[1,8], index: 8, kind: input, shape index: {}]   ;;  %s3723_s9 = inlined_call_operand.vmem [shape: f32[128,8], index: 9, kind: input, shape index: {}]   ;;  %s3724_s10 = inlined_call_operand.vmem [shape: f32[8,128], index: 10, kind: input, shape index: {}]   ;;  %s3725_s11 = inlined_call_operand.hbm [shape: f32[2,16,128], index: 11, kind: output, shape index: {}]  }
   0x1   :  { %17 = vsyncpa [#allocation7], 0 }
   0x2   :  { %18 = vsyncpa [#allocation5], 0  ;;  %s3187_s17 = smov [#allocation3]   ;;  %s3115_s21 = scalar_lea.hbm %s3717_s3, 6144 }
   0x3   :  { %s30_s18 = sshll.u32 %s3187_s17, 4  ;;  %p3116_p0 = scmp.ne.s32.totalorder %s3717_s3, %s3115_s21  ;;  %s31_s18 = int_to_ptr.vmem [resolvable:$true] %s30_s18 }
   0x4   :  { %p3119_p1 = scmp.lt.u32.totalorder %s3115_s21, %s3717_s3 }
   0x6   :  { %p3121_p2 = pnand %p3119_p1, %p3116_p0 }
   0x8   :  { %3124 = shalt.err (!%p3121_p2)
}
   0x9   :  { %s3125_s26 = scalar_lea.vmem %s31_s18, 6144  ;;  %p3130_p4 = scmp.lt.s32.totalorder %s31_s18, %s31_s18 }
   0xa   :  { %p3126_p3 = scmp.ne.s32.totalorder %s31_s18, %s3125_s26  ;;  %p3131_p5 = scmp.lt.s32.totalorder %s3125_s26, %s3125_s26 }
   0xc   :  { %p3132_p6 = por %p3131_p5, %p3130_p4 }
   0xe   :  { %p3133_p7 = pnand %p3132_p6, %p3126_p3 }
  0x10   :  { %3136 = shalt.err (!%p3133_p7)
}
  0x11   :  { %s3188_s27 = smov 128   ;;  %s3189_s28 = smov 8  }
  0x12   :  { %36 = dma.hbm_to_vmem [thread:$0]  %s3717_s3, 6144, %s31_s18, [#allocation4], %s3188_s27, %s3188_s27, %s3189_s28  }
  0x13   :  { %s3190_s12 = smov [#allocation6]   ;;  %s3137_s16 = scalar_lea.hbm %s3718_s4, 6144 }
  0x14   :  { %s42_s13 = sshll.u32 %s3190_s12, 4  ;;  %p3138_p8 = scmp.ne.s32.totalorder %s3718_s4, %s3137_s16  ;;  %s43_s13 = int_to_ptr.vmem [resolvable:$true] %s42_s13 }
  0x15   :  { %p3141_p9 = scmp.lt.u32.totalorder %s3137_s16, %s3718_s4 }
  0x17   :  { %p3143_p10 = pnand %p3141_p9, %p3138_p8 }
  0x19   :  { %3146 = shalt.err (!%p3143_p10)
}
  0x1a   :  { %s3147_s22 = scalar_lea.vmem %s43_s13, 6144  ;;  %p3152_p12 = scmp.lt.s32.totalorder %s43_s13, %s43_s13 }
  0x1b   :  { %p3148_p11 = scmp.ne.s32.totalorder %s43_s13, %s3147_s22  ;;  %p3153_p13 = scmp.lt.s32.totalorder %s3147_s22, %s3147_s22 }
  0x1d   :  { %p3154_p0 = por %p3153_p13, %p3152_p12 }
  0x1f   :  { %p3155_p1 = pnand %p3154_p0, %p3148_p11 }
  0x21   :  { %3158 = shalt.err (!%p3155_p1)
}
  0x22   :  { %48 = dma.hbm_to_vmem [thread:$0]  %s3718_s4, 6144, %s43_s13, [#allocation7], %s3188_s27, %s3188_s27, %s3189_s28  }
  0x23   :  { %3181 = dma.done.wait [#allocation4], 6144  }
  0x24   :  { %3182 = vsyncadd [#allocation4], 4294961152 }
  0x25   :  { %3183 = dma.done.wait [#allocation7], 6144  }
  0x26   :  { %3184 = vsyncadd [#allocation7], 4294961152  ;;  %v3191_v0 = vmov 0.0|0.0   ;;  %vm3192_vm0 = vmmov 0   ;;  %v3193_v1 = vmov 0.0   ;;  %v161_v2 = vld [vmem:[%s3716_s2] sm:$0xff]  ;;  %v83_v9 = vlaneseq }
  0x27   :  { %2770 = vmatprep.subr.bf16.mxu0 %v3191_v0  ;;  %2357 = vmatprep.mubr.msk.f32.mxu0 %vm3192_vm0, %v3193_v1  ;;  %1314 = vst [vmem:[#allocation2] sm:$0x1] %v3193_v1  ;;  %1315 = vst [vmem:[#allocation2 + $0x18] sm:$0x1] %v3193_v1  ;;  %v162_v3 = vld [vmem:[%s3716_s2 + $0x8] sm:$0xff]  ;;  %v163_v4 = vld [vmem:[%s3716_s2 + $0x10] sm:$0xff] }
  0x28   :  { %1316 = vst [vmem:[#allocation2 + $0x11] sm:$0x1] %v3193_v1  ;;  %1317 = vst [vmem:[#allocation2 + $0x29] sm:$0x1] %v3193_v1  ;;  %v2771_v5 = vpack.c.bf16 %v162_v3, %v161_v2  ;;  %v164_v6 = vld [vmem:[%s3716_s2 + $0x18] sm:$0xff]  ;;  %v165_v11 = vld [vmem:[%s3716_s2 + $0x20] sm:$0xff] }
  0x29   :  { %v3194_v7 = vmov 1983009808   ;;  %v2774_v10 = vpack.c.bf16 %v164_v6, %v163_v4  ;;  %v166_v12 = vld [vmem:[%s3716_s2 + $0x28] sm:$0xff]  ;;  %v3312_v14 = vshrl.u32 %v83_v9, 7  ;;  %v67_v16 = vld [vmem:[%s3715_s1] sm:$0xff]  ;;  %v167_v17 = vld [vmem:[%s3716_s2 + $0x30] sm:$0xff] }
  0x2a   :  { %v81_v8 = vunpack.c.l.s4 %v3194_v7  ;;  %2772 = vmatpush3.bf16.msra.mxu0 %v2771_v5  ;;  %v2777_v15 = vpack.c.bf16 %v166_v12, %v165_v11  ;;  %v168_v18 = vld [vmem:[%s3716_s2 + $0x38] sm:$0xff]  ;;  %v169_v19 = vld [vmem:[%s3716_s2 + $0x40] sm:$0xff]  ;;  %v79_v20 = vcombine.high %v67_v16, %v67_v16  ;;  %v68_v23 = vld [vmem:[%s3715_s1 + $0x8] sm:$0xff]  ;;  %vm551_vm1 = vcmask 1046528  }
  0x2b   :  { %2773 = vmatprep.subr.bf16.mxu0 %v3191_v0  ;;  %v2780_v22 = vpack.c.bf16 %v168_v18, %v167_v17  ;;  %v567_v24 = vld [vmem:[#allocation3 + $0x80] sm:$0xff]  ;;  %v568_v25 = vld [vmem:[#allocation3 + $0x88] sm:$0xff]  ;;  %v170_v26 = vld [vmem:[%s3716_s2 + $0x48] sm:$0xff]  ;;  %v96_v31 = vcombine.high %v68_v23, %v68_v23  ;;  %vm753_vm2 = vcmask 1045504   ;;  %vm971_vm3 = vcmask 64512  }
  0x2c   :  { %v82_v13 = vunpack.c.0.s8 %v81_v8  ;;  %v569_v27 = vld [vmem:[#allocation3 + $0x90] sm:$0xff]  ;;  %v570_v28 = vld [vmem:[#allocation3 + $0x98] sm:$0xff]  ;;  %v2794_v32 = vpack.c.bf16 %v568_v25, %v567_v24  ;;  %v2783_v33 = vpack.c.bf16 %v170_v26, %v169_v19  ;;  %v571_v35 = vld [vmem:[#allocation3 + $0xa0] sm:$0xff] }
  0x2d   :  { %v2798_v34 = vpack.c.bf16 %v570_v28, %v569_v27  ;;  %v572_v36 = vld [vmem:[#allocation3 + $0xa8] sm:$0xff]  ;;  %v171_v37 = vld [vmem:[%s3716_s2 + $0x50] sm:$0xff]  ;;  %v173_v46 = vld [vmem:[%s3716_s2 + $0x60] sm:$0xff] }
  0x2e   :  { %2775 = vmatpush3.bf16.msra.mxu0 %v2774_v10  ;;  %v3328_v21 = vsub.s32 %v82_v13, %v3312_v14  ;;  %v172_v38 = vld [vmem:[%s3716_s2 + $0x58] sm:$0xff]  ;;  %2795 = vmatprep.subr.bf16.mxu1 %v2794_v32  ;;  %v2802_v44 = vpack.c.bf16 %v572_v36, %v571_v35  ;;  %v174_v47 = vld [vmem:[%s3716_s2 + $0x68] sm:$0xff]  ;;  %v71_v54 = vld [vmem:[%s3715_s1 + $0x20] sm:$0xff] }
  0x2f   :  { %2776 = vmatprep.subr.bf16.mxu0 %v3191_v0  ;;  %2797 = vmatpush3.bf16.msra.mxu1 %v2794_v32  ;;  %v70_v43 = vld [vmem:[%s3715_s1 + $0x18] sm:$0xff]  ;;  %v2786_v45 = vpack.c.bf16 %v172_v38, %v171_v37  ;;  %v2789_v55 = vpack.c.bf16 %v174_v47, %v173_v46  ;;  %v175_v56 = vld [vmem:[%s3716_s2 + $0x70] sm:$0xff]  ;;  %v137_v60 = vcombine.high %v71_v54, %v71_v54  ;;  %v2097_v25 = vld.sshfl [vmem:[%s3715_s1 + $0x28] sm:$0x3 pattern:$0x76325410] }
  0x30   :  { %v86_v29 = vrot.slane %v67_v16, %v3328_v21  ;;  %v93_v30 = vrot.slane %v79_v20, %v3328_v21  ;;  %v103_v39 = vrot.slane %v68_v23, %v3328_v21  ;;  %v110_v42 = vrot.slane %v96_v31, %v3328_v21  ;;  %2799 = vmatprep.subr.bf16.mxu1 %v2798_v34  ;;  %v176_v57 = vld [vmem:[%s3716_s2 + $0x78] sm:$0xff]  ;;  %v2096_v4 = vld.sshfl [vmem:[%s3715_s1 + $0x10] sm:$0x3 pattern:$0x76325410]  ;;  %v577_v35 = vld [vmem:[#allocation3 + $0xd0] sm:$0xff] }
  0x31   :  { %v120_v48 = vcombine.high %v70_v43, %v70_v43  ;;  %v127_v49 = vrot.slane %v70_v43, %v3328_v21  ;;  %v144_v61 = vrot.slane %v71_v54, %v3328_v21  ;;  %v2792_v5 = vpack.c.bf16 %v176_v57, %v175_v56  ;;  %v575_v32 = vld [vmem:[#allocation3 + $0xc0] sm:$0xff]  ;;  %v578_v36 = vld [vmem:[#allocation3 + $0xd8] sm:$0xff]  ;;  %v883_v47 = vld [vmem:[%s3723_s9] sm:$0xff] }
  0x32   :  { %2778 = vmatpush3.bf16.msra.mxu0 %v2777_v15  ;;  %v94_v40 = vcombine.high %v86_v29, %v86_v29  ;;  %v95_v41 = vcombine.high %v93_v30, %v93_v30  ;;  %v111_v52 = vcombine.high %v103_v39, %v103_v39  ;;  %v112_v53 = vcombine.high %v110_v42, %v110_v42  ;;  %v579_v38 = vld [vmem:[#allocation3 + $0xe0] sm:$0xff]  ;;  %v888_v54 = vld [vmem:[%s3723_s9 + $0x28] sm:$0xff] }
  0x33   :  { %2779 = vmatprep.subr.bf16.mxu0 %v3191_v0  ;;  %2801 = vmatpush3.bf16.msra.mxu1 %v2798_v34  ;;  %v134_v58 = vrot.slane %v120_v48, %v3328_v21  ;;  %v135_v59 = vcombine.high %v127_v49, %v127_v49  ;;  %v211_v6 = vcombine.low %v2096_v4, %v127_v49  ;;  %v884_v48 = vld [vmem:[%s3723_s9 + $0x8] sm:$0xff]  ;;  %v885_v49 = vld [vmem:[%s3723_s9 + $0x10] sm:$0xff] }
  0x34   :  { %v177_v50 = vcombine.low %v86_v29, %v94_v40  ;;  %v178_v51 = vcombine.low %v93_v30, %v95_v41  ;;  %2803 = vmatprep.subr.bf16.mxu1 %v2802_v44  ;;  %v194_v2 = vcombine.low %v103_v39, %v111_v52  ;;  %v195_v3 = vcombine.low %v110_v42, %v112_v53  ;;  %v573_v29 = vld [vmem:[#allocation3 + $0xb0] sm:$0xff]  ;;  %v574_v30 = vld [vmem:[#allocation3 + $0xb8] sm:$0xff]  ;;  %v580_v39 = vld [vmem:[#allocation3 + $0xe8] sm:$0xff] }
  0x35   :  { %v212_v7 = vcombine.low %v135_v59, %v134_v58  ;;  %v136_v8 = vcombine.high %v134_v58, %v134_v58  ;;  %v151_v9 = vrot.slane %v137_v60, %v3328_v21  ;;  %v152_v13 = vcombine.high %v144_v61, %v144_v61  ;;  %v581_v41 = vld [vmem:[#allocation3 + $0xf0] sm:$0xff]  ;;  %v582_v42 = vld [vmem:[#allocation3 + $0xf8] sm:$0xff] }
  0x36   :  { %2781 = vmatpush3.bf16.msra.mxu0 %v2780_v22  ;;  %v185_v62 = vrot.slane %v177_v50, %v3328_v21  ;;  %v192_v63 = vrot.slane %v178_v51, %v3328_v21  ;;  %v202_v11 = vrot.slane %v194_v2, %v3328_v21  ;;  %v209_v12 = vrot.slane %v195_v3, %v3328_v21  ;;  %v886_v51 = vld [vmem:[%s3723_s9 + $0x18] sm:$0xff]  ;;  %v887_v53 = vld [vmem:[%s3723_s9 + $0x20] sm:$0xff] }
  0x37   :  { %2782 = vmatprep.subr.bf16.mxu0 %v3191_v0  ;;  %2805 = vmatpush3.bf16.msra.mxu1 %v2802_v44  ;;  %v219_v15 = vrot.slane %v211_v6, %v3328_v21  ;;  %v226_v17 = vrot.slane %v212_v7, %v3328_v21  ;;  %v228_v18 = vcombine.low %v136_v8, %v144_v61  ;;  %v529_v44 = vld [vmem:[#allocation3] sm:$0xff] }
  0x38   :  { %v193_v10 = vcombine.low %v185_v62, %v192_v63  ;;  %v210_v16 = vcombine.low %v202_v11, %v209_v12  ;;  %v229_v19 = vcombine.low %v152_v13, %v151_v9  ;;  %v153_v24 = vcombine.high %v151_v9, %v151_v9 }
  0x39   :  { %v227_v20 = vcombine.low %v219_v15, %v226_v17  ;;  %v236_v22 = vrot.slane %v228_v18, %v3328_v21  ;;  %v2806_v31 = vpack.c.bf16 %v574_v30, %v573_v29  ;;  %v2814_v37 = vpack.c.bf16 %v578_v36, %v577_v35 }
  0x3a   :  { %2784 = vmatpush3.bf16.msra.mxu0 %v2783_v33  ;;  %v243_v23 = vrot.slane %v229_v19, %v3328_v21  ;;  %v245_v27 = vcombine.low %v153_v24, %v2097_v25  ;;  %v576_v33 = vld [vmem:[#allocation3 + $0xc8] sm:$0xff]  ;;  %v2818_v40 = vpack.c.bf16 %v580_v39, %v579_v38  ;;  %v2822_v43 = vpack.c.bf16 %v582_v42, %v581_v41  ;;  %v350_v19 = vld [vmem:[%s3714_s0 + $0x10] sm:$0x3]  ;;  %v349_v39 = vld [vmem:[%s3714_s0 + $0x8] sm:$0xff] }
  0x3b   :  { %2785 = vmatprep.subr.bf16.mxu0 %v3191_v0  ;;  %2807 = vmatprep.subr.bf16.mxu1 %v2806_v31  ;;  %v2810_v34 = vpack.c.bf16 %v576_v33, %v575_v32  ;;  %v3411_v50 = vpack.c.bf16 %v884_v48, %v883_v47  ;;  %v3417_v52 = vpack.c.bf16 %v886_v51, %v885_v49  ;;  %v348_v32 = vld [vmem:[%s3714_s0] sm:$0xff]  ;;  %v351_v51 = vld [vmem:[%s3714_s0 + $0x18] sm:$0xff] }
  0x3c   :  { %v244_v26 = vcombine.low %v236_v22, %v243_v23  ;;  %v252_v28 = vrot.slane %v245_v27, %v3328_v21  ;;  %2809 = vmatpush3.bf16.msra.mxu1 %v2806_v31 }
  0x3d   :  { %2811 = vmatprep.subr.bf16.mxu1 %v2810_v34 }
  0x3e   :  { %2787 = vmatpush3.bf16.msra.mxu0 %v2786_v45  ;;  %v530_v45 = vld [vmem:[#allocation3 + $0x8] sm:$0xff] }
  0x3f   :  { %2788 = vmatprep.subr.bf16.mxu0 %v3191_v0  ;;  %v3399_v46 = vpack.c.bf16 %v530_v45, %v529_v44 }
  0x40   :  { %2813 = vmatpush3.bf16.msra.mxu1 %v2810_v34 }
  0x41   :  { %2815 = vmatprep.subr.bf16.mxu1 %v2814_v37 }
  0x42   :  { %2790 = vmatpush3.bf16.msra.mxu0 %v2789_v55  ;;  %v3427_v55 = vpack.c.bf16 %v888_v54, %v887_v53 }
  0x43   :  { %2791 = vmatprep.subr.bf16.mxu0 %v3191_v0 }
  0x44   :  { %2817 = vmatpush3.bf16.msra.mxu1 %v2814_v37 }
  0x45   :  { %2819 = vmatprep.subr.bf16.mxu1 %v2818_v40 }
  0x46   :  { %2793 = vmatpush3.bf16.msra.mxu0 %v2792_v5 }
  0x47   :  { %2890 = vmatprep.subr.bf16.mxu0 %v3191_v0 }
  0x48   :  { %2821 = vmatpush3.bf16.msra.mxu1 %v2818_v40 }
  0x49   :  { %2358 = vmatmul.mubr.f32.vlgmr.msra.gmra.mrb[0].mxu0 %v193_v10  ;;  %2823 = vmatprep.subr.bf16.mxu1 %v2822_v43 }
  0x4a   :  { %2360 = vmatprep.mubr.msk.f32.mxu0 %vm3192_vm0, %v3193_v1  ;;  %2892 = vmatpush3.bf16.msra.mxu0 %v3411_v50 }
  0x4b   :  { %2893 = vmatprep.subr.bf16.mxu0 %v3191_v0 }
  0x4c   :  { %2825 = vmatpush3.bf16.msra.mxu1 %v2822_v43 }
  0x4d   :  { %2361 = vmatmul.mubr.f32.gmra.mrb[2].mxu0 %v210_v16  ;;  %2827 = vmatprep.subr.bf16.mxu1 %v3399_v46 }
  0x4e   :  { %2363 = vmatprep.mubr.msk.f32.mxu0 %vm3192_vm0, %v3193_v1  ;;  %2895 = vmatpush3.bf16.msra.mxu0 %v3417_v52 }
  0x4f   :  { %2896 = vmatprep.subr.bf16.mxu0 %v3191_v0 }
  0x51   :  { %2364 = vmatmul.mubr.f32.gmra.mrb[4].mxu0 %v227_v20 }
  0x52   :  { %2366 = vmatprep.mubr.msk.f32.mxu0 %vm3192_vm0, %v3193_v1  ;;  %2898 = vmatpush3.bf16.msra.mxu0 %v3427_v55 }
  0x53   :  { %2899 = vmatprep.subr.bf16.mxu0 %v3191_v0 }
  0x55   :  { %2367 = vmatmul.mubr.f32.gmra.mrb[6].mxu0 %v244_v26 }
  0x56   :  { %2369 = vmatprep.mubr.msk.f32.mxu0 %vm3192_vm0, %v3193_v1 }
  0x59   :  { %2370 = vmatmul.mubr.f32.gmra.mrb[8].mxu0 %v252_v28 }
  0x5a   :  { %2518 = vmatprep.mubr.msk.f32.mxu0 %vm3192_vm0, %v3193_v1 }
 0x11c   :  { %v324_v56 = vpop.f32.mrb[0].mxu0 }
 0x11d   :  { %v359_v57 = vcombine.high %v324_v56, %v324_v56  ;;  %v366_v58 = vrot.slane %v324_v56, %v3328_v21  ;;  %v2359_v59 = vpop.f32.mrb[1].mxu0  ;;  %v531_v56 = vld [vmem:[#allocation3 + $0x10] sm:$0xff] }
 0x11f   :  { %v373_v60 = vrot.slane %v359_v57, %v3328_v21  ;;  %v374_v61 = vcombine.high %v366_v58, %v366_v58  ;;  %v532_v57 = vld [vmem:[#allocation3 + $0x18] sm:$0xff] }
 0x120   :  { %v329_v62 = vpop.f32.mrb[2].mxu0 }
 0x121   :  { %v375_v63 = vcombine.high %v373_v60, %v373_v60  ;;  %v376_v2 = vcombine.high %v329_v62, %v329_v62  ;;  %v383_v3 = vrot.slane %v329_v62, %v3328_v21  ;;  %v2362_v4 = vpop.f32.mrb[3].mxu0  ;;  %v435_v5 = vcombine.low %v366_v58, %v374_v61  ;;  %v353_v62 = vld [vmem:[%s3714_s0 + $0x28] sm:$0x3] }
 0x123   :  { %v436_v6 = vcombine.low %v373_v60, %v375_v63  ;;  %v390_v7 = vrot.slane %v376_v2, %v3328_v21  ;;  %v391_v8 = vcombine.high %v383_v3, %v383_v3  ;;  %v443_v16 = vrot.slane %v435_v5, %v3328_v21 }
 0x124   :  { %v334_v9 = vpop.f32.mrb[4].mxu0 }
 0x125   :  { %v450_v10 = vrot.slane %v436_v6, %v3328_v21  ;;  %v392_v11 = vcombine.high %v390_v7, %v390_v7  ;;  %v452_v12 = vcombine.low %v383_v3, %v391_v8  ;;  %v393_v13 = vcombine.high %v334_v9, %v334_v9  ;;  %v2365_v15 = vpop.f32.mrb[5].mxu0 }
 0x126   :  { %v400_v17 = vrot.slane %v334_v9, %v3328_v21  ;;  %v2830_v8 = vpack.c.bf16 %v532_v57, %v531_v56  ;;  %v352_v9 = vld [vmem:[%s3714_s0 + $0x20] sm:$0xff]  ;;  %v773_v56 = vld [vmem:[#allocation3 + $0x120] sm:$0xff]  ;;  %v774_v57 = vld [vmem:[#allocation3 + $0x128] sm:$0xff] }
 0x127   :  { %v453_v18 = vcombine.low %v390_v7, %v392_v11  ;;  %v407_v20 = vrot.slane %v393_v13, %v3328_v21  ;;  %v451_v22 = vcombine.low %v443_v16, %v450_v10  ;;  %v460_v23 = vrot.slane %v452_v12, %v3328_v21 }
 0x128   :  { %v408_v24 = vcombine.high %v400_v17, %v400_v17  ;;  %v475_v25 = vrot.slane %v400_v17, %v3328_v21  ;;  %v339_v26 = vpop.f32.mrb[6].mxu0  ;;  %v533_v17 = vld [vmem:[#allocation3 + $0x20] sm:$0xff] }
 0x129   :  { %v467_v27 = vrot.slane %v453_v18, %v3328_v21  ;;  %v409_v28 = vcombine.high %v407_v20, %v407_v20  ;;  %v410_v29 = vcombine.high %v339_v26, %v339_v26  ;;  %v417_v30 = vrot.slane %v339_v26, %v3328_v21  ;;  %v2368_v31 = vpop.f32.mrb[7].mxu0  ;;  %v535_v26 = vld [vmem:[#allocation3 + $0x30] sm:$0xff] }
 0x12a   :  { %v476_v33 = vcombine.low %v408_v24, %v407_v20  ;;  %v525_v34 = vadd.f32 %v475_v25, %v350_v19  ;;  %v523_v42 = vadd.f32 %v451_v22, %v348_v32 }
 0x12b   :  { %v468_v35 = vcombine.low %v460_v23, %v467_v27  ;;  %v424_v36 = vrot.slane %v410_v29, %v3328_v21  ;;  %v425_v37 = vcombine.high %v417_v30, %v417_v30  ;;  %v477_v38 = vcombine.low %v409_v28, %v417_v30  ;;  %v536_v27 = vld [vmem:[#allocation3 + $0x38] sm:$0xff] }
 0x12c   :  { %v484_v40 = vrot.slane %v476_v33, %v3328_v21  ;;  %v344_v41 = vpop.f32.mrb[8].mxu0  ;;  %v757_v49 = vrot.slane %v525_v34, 2  ;;  %v555_v54 = vrot.slane %v525_v34, 1  ;;  %v552_v63 = vrot.slane %v523_v42, 1  ;;  %v537_v33 = vld [vmem:[#allocation3 + $0x40] sm:$0xff]  ;;  %v538_v34 = vld [vmem:[#allocation3 + $0x48] sm:$0xff] }
 0x12d   :  { %v491_v43 = vrot.slane %v477_v38, %v3328_v21  ;;  %v493_v44 = vcombine.low %v425_v37, %v424_v36  ;;  %v426_v45 = vcombine.high %v424_v36, %v424_v36  ;;  %v433_v47 = vrot.slane %v344_v41, %v3328_v21  ;;  %v2371_v48 = vpop.f32.mrb[9].mxu0  ;;  %v539_v36 = vld [vmem:[#allocation3 + $0x50] sm:$0xff]  ;;  %v540_v37 = vld [vmem:[#allocation3 + $0x58] sm:$0xff] }
 0x12e   :  { %v3460_v53 = vadd.f32 %v468_v35, %v349_v39  ;;  %v754_v3 = vrot.slane %v523_v42, 2  ;;  %v2838_v32 = vpack.c.bf16 %v536_v27, %v535_v26  ;;  %v2842_v35 = vpack.c.bf16 %v538_v34, %v537_v33  ;;  %v541_v39 = vld [vmem:[#allocation3 + $0x60] sm:$0xff]  ;;  %v3556_v27 = vld [vmem:[%s3724_s10] sm:$0xff] }
 0x12f   :  { %v492_v58 = vcombine.low %v484_v40, %v491_v43  ;;  %v501_v59 = vrot.slane %v493_v44, %v3328_v21  ;;  %v434_v60 = vcombine.high %v433_v47, %v433_v47  ;;  %v494_v61 = vcombine.low %v426_v45, %v433_v47  ;;  %v542_v40 = vld [vmem:[#allocation3 + $0x68] sm:$0xff]  ;;  %v543_v43 = vld [vmem:[#allocation3 + $0x70] sm:$0xff]  ;;  %v544_v44 = vld [vmem:[#allocation3 + $0x78] sm:$0xff] }
 0x130   :  { %v553_v2 = vrot.slane %v3460_v53, 1  ;;  %v755_v4 = vrot.slane %v3460_v53, 2  ;;  %v2846_v38 = vpack.c.bf16 %v540_v37, %v539_v36  ;;  %v2850_v41 = vpack.c.bf16 %v542_v40, %v541_v39  ;;  %v769_v47 = vld [vmem:[#allocation3 + $0x100] sm:$0xff] }
 0x131   :  { %v3468_v5 = vadd.f32 %v492_v58, %v351_v51  ;;  %v508_v6 = vrot.slane %v494_v61, %v3328_v21  ;;  %v516_v7 = vrot.slane %v434_v60, %v3328_v21  ;;  %v534_v21 = vld [vmem:[#allocation3 + $0x28] sm:$0xff]  ;;  %v2854_v45 = vpack.c.bf16 %v544_v44, %v543_v43  ;;  %v772_v51 = vld [vmem:[#allocation3 + $0x118] sm:$0xff] }
 0x132   :  { %v554_v10 = vsel %vm551_vm1, %v552_v63, %v553_v2  ;;  %v556_v11 = vsel %vm551_vm1, %v553_v2, %v555_v54  ;;  %v3478_v12 = vsel %vm753_vm2, %v754_v3, %v755_v4  ;;  %v3481_v13 = vsel %vm753_vm2, %v755_v4, %v757_v49  ;;  %v771_v49 = vld [vmem:[#allocation3 + $0x110] sm:$0xff]  ;;  %v776_v60 = vld [vmem:[#allocation3 + $0x138] sm:$0xff]  ;;  %v778_v63 = vld [vmem:[#allocation3 + $0x148] sm:$0xff] }
 0x133   :  { %v509_v15 = vcombine.low %v501_v59, %v508_v6  ;;  %v528_v16 = vadd.f32 %v516_v7, %v353_v62  ;;  %2404 = vmatprep.mubr.f32.mxu1 %v554_v10  ;;  %v557_v18 = vrot.slane %v3468_v5, 1  ;;  %v759_v22 = vrot.slane %v3468_v5, 2  ;;  %v775_v59 = vld [vmem:[#allocation3 + $0x130] sm:$0xff]  ;;  %v777_v62 = vld [vmem:[#allocation3 + $0x140] sm:$0xff]  ;;  %v782_v6 = vld [vmem:[#allocation3 + $0x168] sm:$0xff] }
 0x134   :  { %2405 = vmatmul.mubr.f32.vlgmr.msra.gmra.mrb[0].mxu1 %v556_v11  ;;  %v2834_v24 = vpack.c.bf16 %v534_v21, %v533_v17  ;;  %v2862_v54 = vpack.c.bf16 %v772_v51, %v771_v49  ;;  %v2866_v58 = vpack.c.bf16 %v774_v57, %v773_v56  ;;  %v2870_v61 = vpack.c.bf16 %v776_v60, %v775_v59  ;;  %v779_v3 = vld [vmem:[#allocation3 + $0x150] sm:$0xff]  ;;  %v889_v11 = vld [vmem:[%s3723_s9 + $0x30] sm:$0xff] }
 0x135   :  { %v527_v19 = vadd.f32 %v509_v15, %v352_v9  ;;  %2829 = vmatpush3.bf16.msra.mxu1 %v3399_v46  ;;  %v560_v20 = vrot.slane %v528_v16, 1  ;;  %v762_v23 = vrot.slane %v528_v16, 2  ;;  %v2874_v2 = vpack.c.bf16 %v778_v63, %v777_v62  ;;  %v784_v9 = vld [vmem:[#allocation3 + $0x178] sm:$0xff]  ;;  %v893_v21 = vld [vmem:[%s3723_s9 + $0x50] sm:$0xff] }
 0x136   :  { %2831 = vmatprep.subr.bf16.mxu1 %v2830_v8  ;;  %v892_v16 = vld [vmem:[%s3723_s9 + $0x48] sm:$0xff]  ;;  %v3595_v44 = vsub.s32 0, %v3312_v14 }
 0x137   :  { %v558_v25 = vrot.slane %v527_v19, 1  ;;  %v760_v28 = vrot.slane %v527_v19, 2 }
 0x139   :  { %2833 = vmatpush3.bf16.msra.mxu1 %v2830_v8  ;;  %v559_v29 = vsel %vm551_vm1, %v557_v18, %v558_v25  ;;  %v561_v30 = vsel %vm551_vm1, %v558_v25, %v560_v20  ;;  %v3489_v31 = vsel %vm753_vm2, %v759_v22, %v760_v28  ;;  %v3492_v46 = vsel %vm753_vm2, %v760_v28, %v762_v23  ;;  %v783_v8 = vld [vmem:[#allocation3 + $0x170] sm:$0xff]  ;;  %v894_v18 = vld [vmem:[%s3723_s9 + $0x58] sm:$0xff]  ;;  %v896_v22 = vld [vmem:[%s3723_s9 + $0x68] sm:$0xff] }
 0x13a   :  { %2407 = vmatprep.mubr.f32.mxu1 %v559_v29  ;;  %2835 = vmatprep.subr.bf16.mxu1 %v2834_v24  ;;  %v2886_v10 = vpack.c.bf16 %v784_v9, %v783_v8  ;;  %v895_v20 = vld [vmem:[%s3723_s9 + $0x60] sm:$0xff]  ;;  %v898_v25 = vld [vmem:[%s3723_s9 + $0x78] sm:$0xff]  ;;  %v1346_v9 = vld [vmem:[#allocation6 + $0x98] sm:$0xff] }
 0x13b   :  { %2408 = vmatmul.mubr.f32.gmra.mrb[2].mxu1 %v561_v30  ;;  %v3539_v23 = vpack.c.bf16 %v896_v22, %v895_v20 }
 0x13c   :  { %2442 = vmatprep.mubr.f32.mxu1 %v523_v42  ;;  %v770_v42 = vld [vmem:[#allocation3 + $0x108] sm:$0xff] }
 0x13d   :  { %2837 = vmatpush3.bf16.msra.mxu1 %v2834_v24  ;;  %v2858_v48 = vpack.c.bf16 %v770_v42, %v769_v47  ;;  %v897_v24 = vld [vmem:[%s3723_s9 + $0x70] sm:$0xff] }
 0x13e   :  { %2839 = vmatprep.subr.bf16.mxu1 %v2838_v32  ;;  %v3549_v26 = vpack.c.bf16 %v898_v25, %v897_v24 }
 0x141   :  { %2841 = vmatpush3.bf16.msra.mxu1 %v2838_v32 }
 0x142   :  { %2843 = vmatprep.subr.bf16.mxu1 %v2842_v35 }
 0x145   :  { %2845 = vmatpush3.bf16.msra.mxu1 %v2842_v35 }
 0x146   :  { %2847 = vmatprep.subr.bf16.mxu1 %v2846_v38 }
 0x149   :  { %2849 = vmatpush3.bf16.msra.mxu1 %v2846_v38 }
 0x14a   :  { %2851 = vmatprep.subr.bf16.mxu1 %v2850_v41 }
 0x14d   :  { %2853 = vmatpush3.bf16.msra.mxu1 %v2850_v41 }
 0x14e   :  { %2855 = vmatprep.subr.bf16.mxu1 %v2854_v45 }
 0x151   :  { %2857 = vmatpush3.bf16.msra.mxu1 %v2854_v45 }
 0x152   :  { %2859 = vmatprep.subr.bf16.mxu1 %v2858_v48 }
 0x154   :  { %2443 = vmatmul.mubr.f32.vlgmr.msra.gmra.mrb[0].mxu1 %v3460_v53  ;;  %v780_v53 = vld [vmem:[#allocation3 + $0x158] sm:$0xff] }
 0x155   :  { %2445 = vmatprep.mubr.f32.mxu1 %v3468_v5  ;;  %2861 = vmatpush3.bf16.msra.mxu1 %v2858_v48  ;;  %v2878_v4 = vpack.c.bf16 %v780_v53, %v779_v3  ;;  %v781_v5 = vld [vmem:[#allocation3 + $0x160] sm:$0xff] }
 0x156   :  { %2863 = vmatprep.subr.bf16.mxu1 %v2862_v54  ;;  %v2882_v7 = vpack.c.bf16 %v782_v6, %v781_v5  ;;  %v1343_v5 = vld [vmem:[#allocation6 + $0x80] sm:$0xff]  ;;  %v1344_v6 = vld [vmem:[#allocation6 + $0x88] sm:$0xff] }
 0x157   :  { %v2938_v8 = vpack.c.bf16 %v1344_v6, %v1343_v5 }
 0x158   :  { %2446 = vmatmul.mubr.f32.gmra.mrb[2].mxu1 %v527_v19  ;;  %v3529_v19 = vpack.c.bf16 %v894_v18, %v893_v21  ;;  %v1350_v21 = vld [vmem:[#allocation6 + $0xb8] sm:$0xff] }
 0x159   :  { %2865 = vmatpush3.bf16.msra.mxu1 %v2862_v54  ;;  %2480 = vmatprep.mubr.f32.mxu1 %v3478_v12  ;;  %v890_v12 = vld [vmem:[%s3723_s9 + $0x38] sm:$0xff] }
 0x15a   :  { %2867 = vmatprep.subr.bf16.mxu1 %v2866_v58  ;;  %v3509_v15 = vpack.c.bf16 %v890_v12, %v889_v11  ;;  %v1347_v11 = vld [vmem:[#allocation6 + $0xa0] sm:$0xff]  ;;  %v1348_v12 = vld [vmem:[#allocation6 + $0xa8] sm:$0xff] }
 0x15c   :  { %2901 = vmatpush3.bf16.msra.mxu0 %v3509_v15 }
 0x15d   :  { %2869 = vmatpush3.bf16.msra.mxu1 %v2866_v58  ;;  %2902 = vmatprep.subr.bf16.mxu0 %v3191_v0 }
 0x15e   :  { %2871 = vmatprep.subr.bf16.mxu1 %v2870_v61 }
 0x161   :  { %2873 = vmatpush3.bf16.msra.mxu1 %v2870_v61 }
 0x162   :  { %2875 = vmatprep.subr.bf16.mxu1 %v2874_v2 }
 0x165   :  { %2877 = vmatpush3.bf16.msra.mxu1 %v2874_v2 }
 0x166   :  { %2879 = vmatprep.subr.bf16.mxu1 %v2878_v4 }
 0x169   :  { %2881 = vmatpush3.bf16.msra.mxu1 %v2878_v4 }
 0x16a   :  { %2883 = vmatprep.subr.bf16.mxu1 %v2882_v7 }
 0x16d   :  { %2885 = vmatpush3.bf16.msra.mxu1 %v2882_v7  ;;  %v1345_v7 = vld [vmem:[#allocation6 + $0x90] sm:$0xff] }
 0x16e   :  { %2887 = vmatprep.subr.bf16.mxu1 %v2886_v10 }
 0x171   :  { %2889 = vmatpush3.bf16.msra.mxu1 %v2886_v10  ;;  %v2942_v10 = vpack.c.bf16 %v1346_v9, %v1345_v7  ;;  %v1325_v9 = vld [vmem:[#allocation6 + $0x18] sm:$0xff] }
 0x172   :  { %2521 = vmatprep.subr.mxu1 %v3193_v1 }
 0x174   :  { %2481 = vmatmul.mubr.f32.vlgmr.msra.gmra.mrb[0].mxu1 %v3481_v13  ;;  %v891_v13 = vld [vmem:[%s3723_s9 + $0x40] sm:$0xff] }
 0x175   :  { %2483 = vmatprep.mubr.f32.mxu1 %v3489_v31  ;;  %v3519_v17 = vpack.c.bf16 %v892_v16, %v891_v13  ;;  %2522 = vmatpush3.msra.mxu1 %v3556_v27  ;;  %v2946_v13 = vpack.c.bf16 %v1348_v12, %v1347_v11  ;;  %v1349_v16 = vld [vmem:[#allocation6 + $0xb0] sm:$0xff] }
 0x176   :  { %2561 = vmatprep.subr.mxu1 %v3193_v1  ;;  %v2950_v18 = vpack.c.bf16 %v1350_v21, %v1349_v16  ;;  %v1328_v16 = vld [vmem:[#allocation6 + $0x30] sm:$0xff]  ;;  %v1329_v21 = vld [vmem:[#allocation6 + $0x38] sm:$0xff] }
 0x177   :  { %2904 = vmatpush3.bf16.msra.mxu0 %v3519_v17 }
 0x178   :  { %2484 = vmatmul.mubr.f32.gmra.mrb[2].mxu1 %v3492_v46  ;;  %2905 = vmatprep.subr.bf16.mxu0 %v3191_v0 }
 0x179   :  { %2523 = vmatprep.mubr.msk.f32.mxu1 %vm3192_vm0, %v3193_v1 }
 0x17b   :  { %2907 = vmatpush3.bf16.msra.mxu0 %v3529_v19 }
 0x17c   :  { %2908 = vmatprep.subr.bf16.mxu0 %v3191_v0 }
 0x17f   :  { %2910 = vmatpush3.bf16.msra.mxu0 %v3539_v23 }
 0x180   :  { %2911 = vmatprep.subr.bf16.mxu0 %v3191_v0 }
 0x183   :  { %2913 = vmatpush3.bf16.msra.mxu0 %v3549_v26 }
 0x184   :  { %2914 = vmatprep.subr.bf16.mxu0 %v3191_v0 }
 0x247   :  { %v3560_v28 = vpop.f32.mrb[0].mxu1 }
 0x248   :  { %v3562_v29 = vpop.f32.mrb[1].mxu1 }
 0x249   :  { %v874_v30 = vadd.f32 %v3560_v28, %v3562_v29 }
 0x24b   :  { %v3566_v31 = vpop.f32.mrb[2].mxu1 }
 0x24c   :  { %v3568_v46 = vpop.f32.mrb[3].mxu1 }
 0x24d   :  { %v875_v32 = vadd.f32 %v874_v30, %v3568_v46  ;;  %v1137_v30 = vld [vmem:[%s3719_s5] sm:$0x1] }
 0x24f   :  { %v876_v33 = vadd.f32 %v3566_v31, %v875_v32 }
 0x251   :  { %v877_v34 = vrot.slane %v876_v33, 4 }
 0x253   :  { %v878_v35 = vadd.f32 %v877_v34, %v876_v33  ;;  %v1141_v34 = vld [vmem:[%s3720_s6] sm:$0x1] }
 0x255   :  { %v879_v36 = vrot.slane %v878_v35, 2 }
 0x257   :  { %v880_v37 = vadd.f32 %v879_v36, %v878_v35 }
 0x259   :  { %v881_v38 = vrot.slane %v880_v37, 1 }
 0x25b   :  { %v882_v39 = vadd.f32 %v881_v38, %v880_v37  ;;  %v1351_v37 = vld [vmem:[#allocation6 + $0xc0] sm:$0xff]  ;;  %v1352_v38 = vld [vmem:[#allocation6 + $0xc8] sm:$0xff] }
 0x25d   :  { %2519 = vmatmul.mubr.f32.vlgmr.msra.gmra.mrb[10].mxu0 %v882_v39  ;;  %v2954_v39 = vpack.c.bf16 %v1352_v38, %v1351_v37  ;;  %v1336_v37 = vld [vmem:[#allocation6 + $0x70] sm:$0xff]  ;;  %v1337_v38 = vld [vmem:[#allocation6 + $0x78] sm:$0xff] }
 0x25e   :  { %2916 = vmatpush3.bf16.msra.mxu0 %v3411_v50  ;;  %2558 = vmatprep.mubr.msk.f32.mxu0 %vm3192_vm0, %v3193_v1 }
 0x25f   :  { %2917 = vmatprep.subr.bf16.mxu0 %v3191_v0 }
 0x262   :  { %2919 = vmatpush3.bf16.msra.mxu0 %v3417_v52 }
 0x263   :  { %2920 = vmatprep.subr.bf16.mxu0 %v3191_v0 }
 0x266   :  { %2922 = vmatpush3.bf16.msra.mxu0 %v3427_v55 }
 0x267   :  { %2923 = vmatprep.subr.bf16.mxu0 %v3191_v0 }
 0x26a   :  { %2925 = vmatpush3.bf16.msra.mxu0 %v3509_v15 }
 0x26b   :  { %2926 = vmatprep.subr.bf16.mxu0 %v3191_v0 }
 0x26e   :  { %2928 = vmatpush3.bf16.msra.mxu0 %v3519_v17 }
 0x26f   :  { %2929 = vmatprep.subr.bf16.mxu0 %v3191_v0 }
 0x272   :  { %2931 = vmatpush3.bf16.msra.mxu0 %v3529_v19 }
 0x273   :  { %2932 = vmatprep.subr.bf16.mxu0 %v3191_v0 }
 0x276   :  { %2934 = vmatpush3.bf16.msra.mxu0 %v3539_v23 }
 0x277   :  { %2935 = vmatprep.subr.bf16.mxu0 %v3191_v0 }
 0x27a   :  { %2937 = vmatpush3.bf16.msra.mxu0 %v3549_v26 }
 0x27b   :  { %2939 = vmatprep.subr.bf16.mxu0 %v2938_v8 }
 0x330   :  { %v965_v40 = vpop.f32.mrb[10].mxu0 }
 0x331   :  { %v969_v41 = vmul.f32 0.001953125, %v965_v40  ;;  %v2520_v43 = vpop.f32.mrb[11].mxu0  ;;  %v1353_v40 = vld [vmem:[#allocation6 + $0xd0] sm:$0xff] }
 0x333   :  { %2524 = vmatmul.mubr.msk.f32.vlgmr.msra.gmra.mrb[4].mxu1 %vm971_vm3, %v969_v41 }
 0x334   :  { %2562 = vmatpush3.msra.mxu1 %v3556_v27  ;;  %2563 = vmatprep.mubr.msk.f32.mxu1 %vm3192_vm0, %v3193_v1 }
 0x335   :  { %2566 = vmatprep.subr.mxu1 %v3193_v1 }
 0x406   :  { %v1041_v45 = vpop.f32.mrb[4].mxu1 }
 0x407   :  { %v1048_v47 = vrot.slane %v1041_v45, %v3595_v44  ;;  %v2525_v42 = vpop.f32.mrb[5].mxu1  ;;  %v1355_v45 = vld [vmem:[#allocation6 + $0xe0] sm:$0xff] }
 0x409   :  { %v1049_v48 = vsub.f32 %v3562_v29, %v1048_v47  ;;  %v1050_v49 = vsub.f32 %v3560_v28, %v1048_v47  ;;  %v1051_v51 = vsub.f32 %v3568_v46, %v1048_v47  ;;  %v1052_v54 = vsub.f32 %v3566_v31, %v1048_v47  ;;  %v1356_v47 = vld [vmem:[#allocation6 + $0xe8] sm:$0xff] }
 0x40a   :  { %v2962_v42 = vpack.c.bf16 %v1356_v47, %v1355_v45  ;;  %v1536_v45 = vld [vmem:[#allocation6 + $0x110] sm:$0xff]  ;;  %v1537_v47 = vld [vmem:[#allocation6 + $0x118] sm:$0xff] }
 0x40b   :  { %v1053_v56 = vmul.f32 %v1049_v48, %v1049_v48  ;;  %v1054_v57 = vmul.f32 %v1050_v49, %v1050_v49  ;;  %v1055_v58 = vmul.f32 %v1051_v51, %v1051_v51  ;;  %v1056_v60 = vmul.f32 %v1052_v54, %v1052_v54  ;;  %v1357_v48 = vld [vmem:[#allocation6 + $0xf0] sm:$0xff]  ;;  %v1358_v49 = vld [vmem:[#allocation6 + $0xf8] sm:$0xff]  ;;  %v1322_v54 = vld [vmem:[#allocation6] sm:$0xff] }
 0x40c   :  { %v2966_v51 = vpack.c.bf16 %v1358_v49, %v1357_v48  ;;  %v1538_v49 = vld [vmem:[#allocation6 + $0x120] sm:$0xff] }
 0x40d   :  { %v1057_v59 = vadd.f32 %v1054_v57, %v1053_v56  ;;  %v1323_v56 = vld [vmem:[#allocation6 + $0x8] sm:$0xff] }
 0x40e   :  { %v2970_v57 = vpack.c.bf16 %v1323_v56, %v1322_v54 }
 0x40f   :  { %v1058_v61 = vadd.f32 %v1057_v59, %v1055_v58 }
 0x411   :  { %v1059_v14 = vadd.f32 %v1058_v61, %v1056_v60 }
 0x413   :  { %v1060_v62 = vrot.slane %v1059_v14, 4 }
 0x415   :  { %v1061_v63 = vadd.f32 %v1060_v62, %v1059_v14 }
 0x417   :  { %v1062_v2 = vrot.slane %v1061_v63, 2 }
 0x419   :  { %v1063_v3 = vadd.f32 %v1062_v2, %v1061_v63 }
 0x41b   :  { %v1064_v53 = vrot.slane %v1063_v3, 1 }
 0x41d   :  { %v1065_v4 = vadd.f32 %v1064_v53, %v1063_v3 }
 0x41f   :  { %2559 = vmatmul.mubr.f32.vlgmr.msra.gmra.mrb[12].mxu0 %v1065_v4 }
 0x420   :  { %2941 = vmatpush3.bf16.msra.mxu0 %v2938_v8  ;;  %v1324_v8 = vld [vmem:[#allocation6 + $0x10] sm:$0xff] }
 0x421   :  { %2943 = vmatprep.subr.bf16.mxu0 %v2942_v10 }
 0x424   :  { %2945 = vmatpush3.bf16.msra.mxu0 %v2942_v10 }
 0x425   :  { %2947 = vmatprep.subr.bf16.mxu0 %v2946_v13 }
 0x428   :  { %2949 = vmatpush3.bf16.msra.mxu0 %v2946_v13  ;;  %v2974_v13 = vpack.c.bf16 %v1325_v9, %v1324_v8  ;;  %v1549_v8 = vld [vmem:[#allocation6 + $0x178] sm:$0xff] }
 0x429   :  { %2951 = vmatprep.subr.bf16.mxu0 %v2950_v18 }
 0x42c   :  { %2953 = vmatpush3.bf16.msra.mxu0 %v2950_v18 }
 0x42d   :  { %2955 = vmatprep.subr.bf16.mxu0 %v2954_v39 }
 0x430   :  { %2957 = vmatpush3.bf16.msra.mxu0 %v2954_v39  ;;  %v2998_v39 = vpack.c.bf16 %v1337_v38, %v1336_v37 }
 0x4f2   :  { %v1132_v20 = vpop.f32.mrb[12].mxu0 }
 0x4f3   :  { %v1136_v22 = vmul.f32 0.001953125, %v1132_v20  ;;  %v2560_v24 = vpop.f32.mrb[13].mxu0  ;;  %v2982_v20 = vpack.c.bf16 %v1329_v21, %v1328_v16 }
 0x4f4   :  { %v1331_v24 = vld [vmem:[#allocation6 + $0x48] sm:$0xff] }
 0x4f5   :  { %v1138_v25 = vadd.f32 1e-05, %v1136_v22  ;;  %v1330_v22 = vld [vmem:[#allocation6 + $0x40] sm:$0xff] }
 0x4f7   :  { %3111 = vrsqrt.f32 %v1138_v25  ;;  %v2986_v25 = vpack.c.bf16 %v1331_v24, %v1330_v22 }
 0x501   :  { %v3112_v32 = vpop.eup %3111 }
 0x502   :  { %v1140_v33 = vmul.f32 %v3112_v32, %v1137_v30  ;;  %v1332_v30 = vld [vmem:[#allocation6 + $0x50] sm:$0xff]  ;;  %v1333_v32 = vld [vmem:[#allocation6 + $0x58] sm:$0xff] }
 0x504   :  { %2564 = vmatmul.mubr.msk.f32.vlgmr.msra.gmra.mrb[6].mxu1 %vm971_vm3, %v1140_v33  ;;  %v1142_v35 = vmul.f32 %v1140_v33, %v969_v41  ;;  %v1354_v41 = vld [vmem:[#allocation6 + $0xd8] sm:$0xff]  ;;  %v2990_v33 = vpack.c.bf16 %v1333_v32, %v1332_v30 }
 0x505   :  { %2567 = vmatpush3.msra.mxu1 %v3556_v27  ;;  %2568 = vmatprep.mubr.msk.f32.mxu1 %vm3192_vm0, %v3193_v1  ;;  %v2958_v43 = vpack.c.bf16 %v1354_v41, %v1353_v40  ;;  %v1534_v40 = vld [vmem:[#allocation6 + $0x100] sm:$0xff]  ;;  %v1535_v41 = vld [vmem:[#allocation6 + $0x108] sm:$0xff] }
 0x506   :  { %v1143_v36 = vsub.f32 %v1141_v34, %v1142_v35  ;;  %3034 = vmatprep.subr.bf16.mxu1 %v3191_v0  ;;  %v1334_v34 = vld [vmem:[#allocation6 + $0x60] sm:$0xff]  ;;  %v1335_v35 = vld [vmem:[#allocation6 + $0x68] sm:$0xff] }
 0x507   :  { %2959 = vmatprep.subr.bf16.mxu0 %v2958_v43 }
 0x508   :  { %2569 = vmatmul.mubr.msk.f32.vlgmr.msra.gmra.mrb[8].mxu1 %vm971_vm3, %v1143_v36  ;;  %2961 = vmatpush3.bf16.msra.mxu0 %v2958_v43  ;;  %v2994_v36 = vpack.c.bf16 %v1335_v35, %v1334_v34  ;;  %v3002_v43 = vpack.c.bf16 %v1535_v41, %v1534_v40 }
 0x509   :  { %3036 = vmatpush3.bf16.msra.mxu1 %v3411_v50  ;;  %2717 = vmatprep.mubr.msk.f32.mxu1 %vm3192_vm0, %v3193_v1 }
 0x50a   :  { %3037 = vmatprep.subr.bf16.mxu1 %v3191_v0  ;;  %2963 = vmatprep.subr.bf16.mxu0 %v2962_v42 }
 0x50c   :  { %2965 = vmatpush3.bf16.msra.mxu0 %v2962_v42  ;;  %v3006_v42 = vpack.c.bf16 %v1537_v47, %v1536_v45 }
 0x50d   :  { %3039 = vmatpush3.bf16.msra.mxu1 %v3417_v52  ;;  %2967 = vmatprep.subr.bf16.mxu0 %v2966_v51 }
 0x50e   :  { %3040 = vmatprep.subr.bf16.mxu1 %v3191_v0 }
 0x510   :  { %2969 = vmatpush3.bf16.msra.mxu0 %v2966_v51  ;;  %v1539_v51 = vld [vmem:[#allocation6 + $0x128] sm:$0xff] }
 0x511   :  { %3042 = vmatpush3.bf16.msra.mxu1 %v3427_v55  ;;  %2971 = vmatprep.subr.bf16.mxu0 %v2970_v57  ;;  %v3010_v56 = vpack.c.bf16 %v1539_v51, %v1538_v49 }
 0x512   :  { %3043 = vmatprep.subr.bf16.mxu1 %v3191_v0 }
 0x515   :  { %3045 = vmatpush3.bf16.msra.mxu1 %v3509_v15 }
 0x516   :  { %3046 = vmatprep.subr.bf16.mxu1 %v3191_v0 }
 0x519   :  { %3048 = vmatpush3.bf16.msra.mxu1 %v3519_v17 }
 0x51a   :  { %3049 = vmatprep.subr.bf16.mxu1 %v3191_v0 }
 0x51d   :  { %3051 = vmatpush3.bf16.msra.mxu1 %v3529_v19 }
 0x51e   :  { %3052 = vmatprep.subr.bf16.mxu1 %v3191_v0 }
 0x521   :  { %3054 = vmatpush3.bf16.msra.mxu1 %v3539_v23 }
 0x522   :  { %3055 = vmatprep.subr.bf16.mxu1 %v3191_v0 }
 0x525   :  { %3057 = vmatpush3.bf16.msra.mxu1 %v3549_v26 }
 0x526   :  { %2720 = vmatprep.subr.mxu1 %v3193_v1 }
 0x5d7   :  { %v1213_v58 = vpop.f32.mrb[6].mxu1 }
 0x5d8   :  { %v1293_v59 = vrot.slane %v1213_v58, %v3595_v44  ;;  %v2565_v60 = vpop.f32.mrb[7].mxu1  ;;  %v1540_v58 = vld [vmem:[#allocation6 + $0x130] sm:$0xff] }
 0x5da   :  { %v1294_v61 = vmul.f32 %v1293_v59, %v3562_v29  ;;  %v1295_v14 = vmul.f32 %v3560_v28, %v1293_v59  ;;  %v1296_v62 = vmul.f32 %v1293_v59, %v3568_v46  ;;  %v1297_v63 = vmul.f32 %v3566_v31, %v1293_v59  ;;  %v1326_v28 = vld [vmem:[#allocation6 + $0x20] sm:$0xff]  ;;  %v1327_v31 = vld [vmem:[#allocation6 + $0x28] sm:$0xff]  ;;  %v1541_v59 = vld [vmem:[#allocation6 + $0x138] sm:$0xff] }
 0x5db   :  { %v1286_v2 = vpop.f32.mrb[8].mxu1  ;;  %v2978_v46 = vpack.c.bf16 %v1327_v31, %v1326_v28 }
 0x5dc   :  { %v1301_v3 = vrot.slane %v1286_v2, %v3595_v44  ;;  %v2570_v53 = vpop.f32.mrb[9].mxu1  ;;  %v1544_v2 = vld [vmem:[#allocation6 + $0x150] sm:$0xff] }
 0x5de   :  { %v1302_v4 = vadd.f32 %v1301_v3, %v1294_v61  ;;  %v1303_v5 = vadd.f32 %v1301_v3, %v1295_v14  ;;  %v1304_v6 = vadd.f32 %v1301_v3, %v1296_v62  ;;  %v1305_v7 = vadd.f32 %v1301_v3, %v1297_v63  ;;  %v1542_v14 = vld [vmem:[#allocation6 + $0x140] sm:$0xff]  ;;  %v1543_v62 = vld [vmem:[#allocation6 + $0x148] sm:$0xff]  ;;  %v1545_v3 = vld [vmem:[#allocation6 + $0x158] sm:$0xff] }
 0x5df   :  { %v3014_v61 = vpack.c.bf16 %v1541_v59, %v1540_v58  ;;  %v3018_v63 = vpack.c.bf16 %v1543_v62, %v1542_v14  ;;  %v3022_v53 = vpack.c.bf16 %v1545_v3, %v1544_v2  ;;  %v1905_v59 = vld [vmem:[%s3722_s8] sm:$0x1] }
 0x5e0   :  { %v1306_v10 = vmax.f32 %v1302_v4, 0.0  ;;  %v1307_v11 = vmax.f32 %v1303_v5, 0.0  ;;  %v1308_v12 = vmax.f32 %v1304_v6, 0.0  ;;  %v1309_v29 = vmax.f32 %v1305_v7, 0.0  ;;  %v1546_v4 = vld [vmem:[#allocation6 + $0x160] sm:$0xff]  ;;  %v1547_v5 = vld [vmem:[#allocation6 + $0x168] sm:$0xff] }
 0x5e1   :  { %v3026_v6 = vpack.c.bf16 %v1547_v5, %v1546_v4  ;;  %v1548_v7 = vld [vmem:[#allocation6 + $0x170] sm:$0xff] }
 0x5e2   :  { %1310 = vst [vmem:[#allocation2 + $0x1] sm:$0xff] %v1306_v10  ;;  %1311 = vst [vmem:[#allocation2 + $0x9] sm:$0xff] %v1307_v11  ;;  %2603 = vmatprep.mubr.f32.mxu0 %v1306_v10  ;;  %v3030_v9 = vpack.c.bf16 %v1549_v8, %v1548_v7 }
 0x5e3   :  { %1312 = vst [vmem:[#allocation2 + $0x19] sm:$0xff] %v1308_v12  ;;  %1313 = vst [vmem:[#allocation2 + $0x21] sm:$0xff] %v1309_v29  ;;  %2604 = vmatmul.mubr.f32.vlgmr.msra.gmra.mrb[14].mxu0 %v1307_v11 }
 0x5e4   :  { %2973 = vmatpush3.bf16.msra.mxu0 %v2970_v57  ;;  %2606 = vmatprep.mubr.f32.mxu0 %v1308_v12 }
 0x5e5   :  { %2975 = vmatprep.subr.bf16.mxu0 %v2974_v13 }
 0x5e7   :  { %2607 = vmatmul.mubr.f32.gmra.mrb[16].mxu0 %v1309_v29 }
 0x5e8   :  { %2977 = vmatpush3.bf16.msra.mxu0 %v2974_v13 }
 0x5e9   :  { %v1318_v18 = vld [vmem:[#allocation2] sm:$0xff]  ;;  %2979 = vmatprep.subr.bf16.mxu0 %v2978_v46  ;;  %v1319_v48 = vld [vmem:[#allocation2 + $0x8] sm:$0xff] }
 0x5ea   :  { %2641 = vmatprep.mubr.f32.mxu0 %v1318_v18  ;;  %v1320_v54 = vld [vmem:[#allocation2 + $0x18] sm:$0xff]  ;;  %v1321_v57 = vld [vmem:[#allocation2 + $0x20] sm:$0xff]  ;;  %v1530_v10 = vld [vmem:[#allocation2 + $0xa] sm:$0xff] }
 0x5eb   :  { %v1529_v60 = vld [vmem:[#allocation2 + $0x2] sm:$0xff]  ;;  %v1531_v11 = vld [vmem:[#allocation2 + $0x1a] sm:$0xff] }
 0x5ec   :  { %2981 = vmatpush3.bf16.msra.mxu0 %v2978_v46  ;;  %v1532_v12 = vld [vmem:[#allocation2 + $0x22] sm:$0xff] }
 0x5ed   :  { %2983 = vmatprep.subr.bf16.mxu0 %v2982_v20 }
 0x5f0   :  { %2985 = vmatpush3.bf16.msra.mxu0 %v2982_v20 }
 0x5f1   :  { %2987 = vmatprep.subr.bf16.mxu0 %v2986_v25 }
 0x5f4   :  { %2989 = vmatpush3.bf16.msra.mxu0 %v2986_v25 }
 0x5f5   :  { %2991 = vmatprep.subr.bf16.mxu0 %v2990_v33 }
 0x5f8   :  { %2993 = vmatpush3.bf16.msra.mxu0 %v2990_v33 }
 0x5f9   :  { %2995 = vmatprep.subr.bf16.mxu0 %v2994_v36 }
 0x5fc   :  { %2997 = vmatpush3.bf16.msra.mxu0 %v2994_v36 }
 0x5fd   :  { %2999 = vmatprep.subr.bf16.mxu0 %v2998_v39 }
 0x600   :  { %3001 = vmatpush3.bf16.msra.mxu0 %v2998_v39 }
 0x601   :  { %3003 = vmatprep.subr.bf16.mxu0 %v3002_v43 }
 0x603   :  { %2642 = vmatmul.mubr.f32.vlgmr.msra.gmra.mrb[14].mxu0 %v1319_v48 }
 0x604   :  { %2644 = vmatprep.mubr.f32.mxu0 %v1320_v54  ;;  %3005 = vmatpush3.bf16.msra.mxu0 %v3002_v43 }
 0x605   :  { %3007 = vmatprep.subr.bf16.mxu0 %v3006_v42 }
 0x607   :  { %2645 = vmatmul.mubr.f32.gmra.mrb[16].mxu0 %v1321_v57 }
 0x608   :  { %3009 = vmatpush3.bf16.msra.mxu0 %v3006_v42  ;;  %2679 = vmatprep.mubr.f32.mxu0 %v1529_v60 }
 0x609   :  { %3011 = vmatprep.subr.bf16.mxu0 %v3010_v56 }
 0x60c   :  { %3013 = vmatpush3.bf16.msra.mxu0 %v3010_v56  ;;  %v1901_v56 = vld [vmem:[%s3721_s7] sm:$0x1]  ;;  %s3195_s7 = smov [#allocation8]  }
 0x60d   :  { %3015 = vmatprep.subr.bf16.mxu0 %v3014_v61  ;;  %s2083_s8 = sshll.u32 %s3195_s7, 4  ;;  %s2084_s8 = int_to_ptr.vmem [resolvable:$true] %s2083_s8 }
 0x60e   :  { %s3159_s15 = scalar_lea.vmem %s2084_s8, 512  ;;  %p3164_p3 = scmp.lt.s32.totalorder %s2084_s8, %s2084_s8 }
 0x60f   :  { %p3160_p2 = scmp.ne.s32.totalorder %s2084_s8, %s3159_s15  ;;  %p3165_p4 = scmp.lt.s32.totalorder %s3159_s15, %s3159_s15 }
 0x610   :  { %3017 = vmatpush3.bf16.msra.mxu0 %v3014_v61 }
 0x611   :  { %3019 = vmatprep.subr.bf16.mxu0 %v3018_v63  ;;  %p3166_p5 = por %p3165_p4, %p3164_p3 }
 0x613   :  { %p3167_p6 = pnand %p3166_p5, %p3160_p2 }
 0x614   :  { %3021 = vmatpush3.bf16.msra.mxu0 %v3018_v63 }
 0x615   :  { %3023 = vmatprep.subr.bf16.mxu0 %v3022_v53 }
 0x618   :  { %3025 = vmatpush3.bf16.msra.mxu0 %v3022_v53 }
 0x619   :  { %3027 = vmatprep.subr.bf16.mxu0 %v3026_v6 }
 0x61c   :  { %3029 = vmatpush3.bf16.msra.mxu0 %v3026_v6 }
 0x61d   :  { %3031 = vmatprep.subr.bf16.mxu0 %v3030_v9 }
 0x620   :  { %3033 = vmatpush3.bf16.msra.mxu0 %v3030_v9 }
 0x623   :  { %2680 = vmatmul.mubr.f32.vlgmr.msra.gmra.mrb[14].mxu0 %v1530_v10 }
 0x624   :  { %2682 = vmatprep.mubr.f32.mxu0 %v1531_v11 }
 0x627   :  { %2683 = vmatmul.mubr.f32.gmra.mrb[16].mxu0 %v1532_v12 }
 0x6f6   :  { %v3638_v29 = vpop.f32.mrb[14].mxu0 }
 0x6f7   :  { %v3640_v13 = vpop.f32.mrb[15].mxu0 }
 0x6f8   :  { %v1639_v28 = vadd.f32 %v3638_v29, %v3640_v13 }
 0x6fa   :  { %v3644_v31 = vpop.f32.mrb[16].mxu0 }
 0x6fb   :  { %v3646_v46 = vpop.f32.mrb[17].mxu0 }
 0x6fc   :  { %v1640_v16 = vadd.f32 %v1639_v28, %v3646_v46 }
 0x6fe   :  { %v1641_v21 = vadd.f32 %v3644_v31, %v1640_v16 }
 0x700   :  { %v1642_v18 = vrot.slane %v1641_v21, 4 }
 0x702   :  { %v1643_v20 = vadd.f32 %v1642_v18, %v1641_v21 }
 0x704   :  { %v1644_v22 = vrot.slane %v1643_v20, 2 }
 0x706   :  { %v1645_v24 = vadd.f32 %v1644_v22, %v1643_v20 }
 0x708   :  { %v1646_v25 = vrot.slane %v1645_v24, 1 }
 0x70a   :  { %v1647_v30 = vadd.f32 %v1646_v25, %v1645_v24 }
 0x70c   :  { %2718 = vmatmul.mubr.f32.vlgmr.msra.gmra.mrb[10].mxu1 %v1647_v30 }
 0x70d   :  { %2721 = vmatpush3.msra.mxu1 %v3556_v27  ;;  %2722 = vmatprep.mubr.msk.f32.mxu1 %vm3192_vm0, %v3193_v1 }
 0x70e   :  { %3058 = vmatprep.subr.bf16.mxu1 %v3191_v0 }
 0x7df   :  { %v1730_v32 = vpop.f32.mrb[10].mxu1 }
 0x7e0   :  { %v1734_v33 = vmul.f32 0.001953125, %v1730_v32  ;;  %v2719_v34 = vpop.f32.mrb[11].mxu1 }
 0x7e2   :  { %2723 = vmatmul.mubr.msk.f32.vlgmr.msra.gmra.mrb[12].mxu1 %vm971_vm3, %v1734_v33 }
 0x7e3   :  { %3060 = vmatpush3.bf16.msra.mxu1 %v3411_v50  ;;  %2757 = vmatprep.mubr.msk.f32.mxu1 %vm3192_vm0, %v3193_v1 }
 0x7e4   :  { %3061 = vmatprep.subr.bf16.mxu1 %v3191_v0 }
 0x7e7   :  { %3063 = vmatpush3.bf16.msra.mxu1 %v3417_v52 }
 0x7e8   :  { %3064 = vmatprep.subr.bf16.mxu1 %v3191_v0 }
 0x7eb   :  { %3066 = vmatpush3.bf16.msra.mxu1 %v3427_v55 }
 0x7ec   :  { %3067 = vmatprep.subr.bf16.mxu1 %v3191_v0 }
 0x7ef   :  { %3069 = vmatpush3.bf16.msra.mxu1 %v3509_v15 }
 0x7f0   :  { %3070 = vmatprep.subr.bf16.mxu1 %v3191_v0 }
 0x7f3   :  { %3072 = vmatpush3.bf16.msra.mxu1 %v3519_v17 }
 0x7f4   :  { %3073 = vmatprep.subr.bf16.mxu1 %v3191_v0 }
 0x7f7   :  { %3075 = vmatpush3.bf16.msra.mxu1 %v3529_v19 }
 0x7f8   :  { %3076 = vmatprep.subr.bf16.mxu1 %v3191_v0 }
 0x7fb   :  { %3078 = vmatpush3.bf16.msra.mxu1 %v3539_v23 }
 0x7fc   :  { %3079 = vmatprep.subr.bf16.mxu1 %v3191_v0 }
 0x7ff   :  { %3081 = vmatpush3.bf16.msra.mxu1 %v3549_v26 }
 0x800   :  { %2760 = vmatprep.subr.mxu1 %v3193_v1 }
 0x8b5   :  { %v1805_v50 = vpop.f32.mrb[12].mxu1 }
 0x8b6   :  { %v1812_v52 = vrot.slane %v1805_v50, %v3595_v44  ;;  %v2724_v55 = vpop.f32.mrb[13].mxu1 }
 0x8b8   :  { %v1813_v15 = vsub.f32 %v3640_v13, %v1812_v52  ;;  %v1814_v17 = vsub.f32 %v3638_v29, %v1812_v52  ;;  %v1815_v19 = vsub.f32 %v3646_v46, %v1812_v52  ;;  %v1816_v35 = vsub.f32 %v3644_v31, %v1812_v52 }
 0x8ba   :  { %v1817_v36 = vmul.f32 %v1813_v15, %v1813_v15  ;;  %v1818_v23 = vmul.f32 %v1814_v17, %v1814_v17  ;;  %v1819_v37 = vmul.f32 %v1815_v19, %v1815_v19  ;;  %v1820_v38 = vmul.f32 %v1816_v35, %v1816_v35 }
 0x8bc   :  { %v1821_v0 = vadd.f32 %v1818_v23, %v1817_v36 }
 0x8be   :  { %v1822_v26 = vadd.f32 %v1821_v0, %v1819_v37 }
 0x8c0   :  { %v1823_v39 = vadd.f32 %v1822_v26, %v1820_v38 }
 0x8c2   :  { %v1824_v40 = vrot.slane %v1823_v39, 4 }
 0x8c4   :  { %v1825_v41 = vadd.f32 %v1824_v40, %v1823_v39 }
 0x8c6   :  { %v1826_v43 = vrot.slane %v1825_v41, 2 }
 0x8c8   :  { %v1827_v45 = vadd.f32 %v1826_v43, %v1825_v41 }
 0x8ca   :  { %v1828_v47 = vrot.slane %v1827_v45, 1 }
 0x8cc   :  { %v1829_v42 = vadd.f32 %v1828_v47, %v1827_v45 }
 0x8ce   :  { %2758 = vmatmul.mubr.f32.vlgmr.msra.gmra.mrb[14].mxu1 %v1829_v42 }
 0x8cf   :  { %2761 = vmatpush3.msra.mxu1 %v3556_v27  ;;  %2762 = vmatprep.mubr.msk.f32.mxu1 %vm3192_vm0, %v3193_v1 }
 0x8d0   :  { %2765 = vmatprep.subr.mxu1 %v3193_v1 }
 0x9a1   :  { %v1896_v48 = vpop.f32.mrb[14].mxu1 }
 0x9a2   :  { %v1900_v49 = vmul.f32 0.001953125, %v1896_v48  ;;  %v2759_v51 = vpop.f32.mrb[15].mxu1 }
 0x9a4   :  { %v1902_v54 = vadd.f32 1e-05, %v1900_v49 }
 0x9a6   :  { %3113 = vrsqrt.f32 %v1902_v54 }
 0x9b0   :  { %v3114_v57 = vpop.eup %3113 }
 0x9b1   :  { %v1904_v58 = vmul.f32 %v3114_v57, %v1901_v56 }
 0x9b3   :  { %2763 = vmatmul.mubr.msk.f32.vlgmr.msra.gmra.mrb[16].mxu1 %vm971_vm3, %v1904_v58  ;;  %v1906_v60 = vmul.f32 %v1904_v58, %v1734_v33 }
 0x9b4   :  { %2766 = vmatpush3.msra.mxu1 %v3556_v27  ;;  %2767 = vmatprep.mubr.msk.f32.mxu1 %vm3192_vm0, %v3193_v1 }
 0x9b5   :  { %v1907_v61 = vsub.f32 %v1905_v59, %v1906_v60 }
 0x9b7   :  { %2768 = vmatmul.mubr.msk.f32.vlgmr.msra.gmra.mrb[18].mxu1 %vm971_vm3, %v1907_v61 }
 0xa86   :  { %v1977_v14 = vpop.f32.mrb[16].mxu1 }
 0xa87   :  { %v2057_v62 = vrot.slane %v1977_v14, %v3595_v44  ;;  %v2764_v63 = vpop.f32.mrb[17].mxu1 }
 0xa89   :  { %v2058_v2 = vmul.f32 %v2057_v62, %v3640_v13  ;;  %v2059_v3 = vmul.f32 %v3638_v29, %v2057_v62  ;;  %v2060_v53 = vmul.f32 %v2057_v62, %v3646_v46  ;;  %v2061_v4 = vmul.f32 %v3644_v31, %v2057_v62 }
 0xa8a   :  { %v2050_v5 = vpop.f32.mrb[18].mxu1 }
 0xa8b   :  { %v2065_v27 = vrot.slane %v2050_v5, %v3595_v44  ;;  %v2769_v6 = vpop.f32.mrb[19].mxu1 }
 0xa8d   :  { %v2066_v1 = vadd.f32 %v2065_v27, %v2058_v2  ;;  %v2067_v7 = vadd.f32 %v2065_v27, %v2059_v3  ;;  %v2068_v8 = vadd.f32 %v2065_v27, %v2060_v53  ;;  %v2069_v9 = vadd.f32 %v2065_v27, %v2061_v4 }
 0xa8f   :  { %v2070_v10 = vmax.f32 %v2066_v1, 0.0  ;;  %v2071_v11 = vmax.f32 %v2067_v7, 0.0  ;;  %v2072_v12 = vmax.f32 %v2068_v8, 0.0  ;;  %v2073_v13 = vmax.f32 %v2069_v9, 0.0 }
 0xa91   :  { %2074 = vst [vmem:[#allocation8] sm:$0xff] %v2070_v10  ;;  %2075 = vst [vmem:[#allocation8 + $0x8] sm:$0xff] %v2071_v11 }
 0xa92   :  { %2076 = vst [vmem:[#allocation8 + $0x10] sm:$0xff] %v2072_v12  ;;  %2077 = vst [vmem:[#allocation8 + $0x18] sm:$0xff] %v2073_v13 }
 0xa93   :  { %3170 = shalt.err (!%p3167_p6)
}
 0xa94   :  { %s3171_s19 = scalar_lea.hbm %s3725_s11, 512 }
 0xa95   :  { %p3172_p7 = scmp.ne.s32.totalorder %s3725_s11, %s3171_s19  ;;  %p3175_p8 = scmp.lt.u32.totalorder %s3171_s19, %s3725_s11 }
 0xa97   :  { %p3177_p9 = pnand %p3175_p8, %p3172_p7 }
 0xa99   :  { %3180 = shalt.err (!%p3177_p9)
}
 0xa9a   :  { %2089 = dma.vmem_to_hbm [thread:$0]  %s2084_s8, 512, %s3725_s11, [#allocation5], %s3188_s27, %s3188_s27, %s3189_s28  }
 0xa9b   :  { %3185 = dma.done.wait [#allocation5], 512  }
 0xa9c   :  { %3186 = vsyncadd [#allocation5], 4294966784 }
 0xa9d   :  { %2093 = vsyncpa [#allocation4], 1 }
 0xa9e   :  { %2094 = vsyncpa [#allocation7], 1 }
 0xa9f   :  { %2095 = vsyncpa [#allocation5], 1 }

</bundles_post_ra>
